<compile_context>
chip_gen: v7x
topology: tpu7x:2x2x1
jax: 0.10.0
libtpu: 0.0.40
codegen_flags: <defaults>
</compile_context>

<pallas_src>
import functools

import jax
import jax.numpy as jnp
from jax.experimental import pallas as pl
from jax.experimental.pallas import tpu as pltpu

INPUT_DIM = 1024
H1 = 512
H2 = 128
LATENT_DIM = 32
OUT_PAD = 128  # lane-dense padded output width (multiple of 128, >= LATENT_DIM)


def fc_encoder_kernel(x_ref, w1_ref, b1_ref, w2_ref, b2_ref, w3_ref, b3_ref, o_ref):
    # Cast the f32 x tile to bf16 in-kernel (VPU work, hidden under the MXU); avoids
    # a separate wrapper-side cast/pad pass over x in HBM.
    x = x_ref[...].astype(jnp.bfloat16)
    # Layer 1: Linear(1024 -> 512) + ReLU.  bf16 MXU inputs, f32 accumulation.
    h1 = jnp.dot(x, w1_ref[...], preferred_element_type=jnp.float32)
    h1 = jnp.maximum(h1 + b1_ref[...], 0.0)
    # Layer 2: Linear(512 -> 128) + ReLU.
    h2 = jnp.dot(h1.astype(jnp.bfloat16), w2_ref[...],
                 preferred_element_type=jnp.float32)
    h2 = jnp.maximum(h2 + b2_ref[...], 0.0)
    # Layer 3: Linear(128 -> 32), zero-padded to 128 output lanes (lane-dense store).
    out = jnp.dot(h2.astype(jnp.bfloat16), w3_ref[...],
                  preferred_element_type=jnp.float32)
    # bf16 store halves output writeback vs f32 while keeping a full-width vst.
    o_ref[...] = (out + b3_ref[...]).astype(jnp.bfloat16)


def prepare_params(w1, b1, w2, b2, w3, b3):
    """One-time parameter preparation (do NOT call per forward pass).

    Casts weights to bf16 (MXU-native), reshapes biases to (1, out) f32, and pads
    layer 3 to OUT_PAD output columns so the kernel's output store is lane-dense.
    Inputs: wi (in_dim, out_dim) f32, bi (out_dim,) f32.
    """
    w1p = w1.astype(jnp.bfloat16)
    w2p = w2.astype(jnp.bfloat16)
    w3p = jnp.pad(w3.astype(jnp.bfloat16), ((0, 0), (0, OUT_PAD - LATENT_DIM)))
    b1p = b1.reshape(1, H1).astype(jnp.float32)
    b2p = b2.reshape(1, H2).astype(jnp.float32)
    b3p = jnp.pad(b3.reshape(1, LATENT_DIM).astype(jnp.float32),
                  ((0, 0), (0, OUT_PAD - LATENT_DIM)))
    return w1p, b1p, w2p, b2p, w3p, b3p


@functools.partial(jax.jit, static_argnames=("block_b",))
def fc_encoder(x, w1, b1, w2, b2, w3, b3, *, block_b=512):
    """Fused FCEncoder forward.

    x: (B, INPUT_DIM) f32.  Params must come from `prepare_params` (bf16 weights,
    layer 3 padded to OUT_PAD).  Returns (B, LATENT_DIM) f32.

    block_b: batch tile (multiple of 128).  VMEM footprint is only a few MiB, so
    pick block_b for pipelining / MXU occupancy: B // block_b should be >= 2 (and
    >= 4 on v7x so each TensorCore gets >= 2 pipelined steps); 512+ recommended on
    v5e/v6e for large batches.
    """
    B, D = x.shape
    assert D == INPUT_DIM
    if B <= block_b:
        block_b = B                      # single block spanning the whole batch
    else:
        assert block_b % 128 == 0, "block_b must be a multiple of 128"
    num_blocks = pl.cdiv(B, block_b)     # ragged tail handled by Pallas boundary blocks

    def const_spec(shape):
        # Grid-invariant operand: constant index_map + single buffer (DMA'd once).
        return pl.BlockSpec(shape, lambda i: (0, 0), pipeline_mode=pl.Buffered(1))

    flops = 2 * B * (INPUT_DIM * H1 + H1 * H2 + H2 * OUT_PAD)
    bytes_accessed = (B * INPUT_DIM * 4                                  # x (f32)
                      + 2 * (INPUT_DIM * H1 + H1 * H2 + H2 * OUT_PAD)    # bf16 weights
                      + 4 * (H1 + H2 + OUT_PAD)                          # f32 biases
                      + B * OUT_PAD * 2)                                 # bf16 output

    out_padded = pl.pallas_call(
        fc_encoder_kernel,
        out_shape=jax.ShapeDtypeStruct((B, OUT_PAD), jnp.bfloat16),
        grid_spec=pl.GridSpec(
            grid=(num_blocks,),
            in_specs=[
                pl.BlockSpec((block_b, INPUT_DIM), lambda i: (i, 0)),    # x tile (f32)
                const_spec((INPUT_DIM, H1)), const_spec((1, H1)),        # layer 1
                const_spec((H1, H2)), const_spec((1, H2)),               # layer 2
                const_spec((H2, OUT_PAD)), const_spec((1, OUT_PAD)),     # layer 3 (padded)
            ],
            out_specs=pl.BlockSpec((block_b, OUT_PAD), lambda i: (i, 0)),
        ),
        compiler_params=pltpu.CompilerParams(
            dimension_semantics=("parallel",),
        ),
        cost_estimate=pl.CostEstimate(flops=flops, transcendentals=0,
                                      bytes_accessed=bytes_accessed),
    )(x, w1, b1, w2, b2, w3, b3)

    # Drop the zero-padded latent columns; return f32 to match the PyTorch module.
    return out_padded[:, :LATENT_DIM].astype(jnp.float32)


def init_params(key):
    """Deterministic init mirroring nn.Linear: W (out, in), b (out,).
    Returned pre-transposed to (in, out) / (out,) f32, ready for prepare_params."""
    def linear(k, in_dim, out_dim):
        kw, kb = jax.random.split(k)
        bound = 1.0 / jnp.sqrt(in_dim)
        w = jax.random.uniform(kw, (out_dim, in_dim), jnp.float32, -bound, bound)
        b = jax.random.uniform(kb, (out_dim,), jnp.float32, -bound, bound)
        return w.T, b

    k1, k2, k3 = jax.random.split(key, 3)
    w1, b1 = linear(k1, INPUT_DIM, H1)
    w2, b2 = linear(k2, H1, H2)
    w3, b3 = linear(k3, H2, LATENT_DIM)
    return w1, b1, w2, b2, w3, b3


def reference_bf16(x, w1, b1, w2, b2, w3, b3):
    """Same mixed precision as the kernel (bf16 matmul inputs, f32 accumulate,
    bf16-rounded output)."""
    h = jnp.dot(x.astype(jnp.bfloat16), w1.astype(jnp.bfloat16),
                preferred_element_type=jnp.float32)
    h = jnp.maximum(h + b1, 0.0)
    h = jnp.dot(h.astype(jnp.bfloat16), w2.astype(jnp.bfloat16),
                preferred_element_type=jnp.float32)
    h = jnp.maximum(h + b2, 0.0)
    out = jnp.dot(h.astype(jnp.bfloat16), w3.astype(jnp.bfloat16),
                  preferred_element_type=jnp.float32) + b3
    return out.astype(jnp.bfloat16).astype(jnp.float32)


def reference_f32(x, w1, b1, w2, b2, w3, b3):
    h = jnp.maximum(x @ w1 + b1, 0.0)
    h = jnp.maximum(h @ w2 + b2, 0.0)
    return h @ w3 + b3


if __name__ == "__main__":
    key = jax.random.PRNGKey(0)
    kx, kp = jax.random.split(key)

    B = 512          # 4 grid steps of 128 rows -> >= 2 pipelined steps per v7x TC
    BLOCK_B = 128    # demo tile; use 512+ for large production batches (v5e/v6e)
    x = jax.random.normal(kx, (B, INPUT_DIM), jnp.float32)

    raw_params = init_params(kp)
    params = prepare_params(*raw_params)   # one-time prep (bf16 cast + layer-3 pad)

    out = fc_encoder(x, *params, block_b=BLOCK_B)
    out = jax.block_until_ready(out)
    assert out.shape == (B, LATENT_DIM), out.shape

    ref = reference_bf16(x, *raw_params)
    err = float(jnp.max(jnp.abs(out - ref)))
    assert jnp.allclose(out, ref, atol=2e-2, rtol=2e-2), err

    ref32 = reference_f32(x, *raw_params)
    err32 = float(jnp.max(jnp.abs(out - ref32)))
    assert jnp.allclose(out, ref32, atol=1e-1, rtol=1e-1), err32

    print("KERNEL_OK")
</pallas_src>

<mosaic_0001>
module attributes {stable_mosaic.version = 11 : i64} {
  func.func @fc_encoder_kernel(%arg0: i32, %arg1: memref<128x1024xf32, #tpu.memory_space<vmem>>, %arg2: memref<1024x512xbf16, #tpu.memory_space<vmem>>, %arg3: memref<1x512xf32, #tpu.memory_space<vmem>>, %arg4: memref<512x128xbf16, #tpu.memory_space<vmem>>, %arg5: memref<1x128xf32, #tpu.memory_space<vmem>>, %arg6: memref<128x128xbf16, #tpu.memory_space<vmem>>, %arg7: memref<1x128xf32, #tpu.memory_space<vmem>>, %arg8: memref<128x128xbf16, #tpu.memory_space<vmem>>) attributes {dimension_semantics = [#tpu.dimension_semantics<parallel>], iteration_bounds = array<i64: 4>, scalar_prefetch = 0 : i64, scratch_operands = 0 : i64, tpu.core_type = #tpu.core_type<tc>, window_params = [{transform_indices = @transform_0, window_bounds = array<i64: 128, 1024>}, {pipeline_mode = #tpu.pipeline_mode<synchronous>, transform_indices = @transform_1, window_bounds = array<i64: 1024, 512>}, {pipeline_mode = #tpu.pipeline_mode<synchronous>, transform_indices = @transform_2, window_bounds = array<i64: 1, 512>}, {pipeline_mode = #tpu.pipeline_mode<synchronous>, transform_indices = @transform_3, window_bounds = array<i64: 512, 128>}, {pipeline_mode = #tpu.pipeline_mode<synchronous>, transform_indices = @transform_4, window_bounds = array<i64: 1, 128>}, {pipeline_mode = #tpu.pipeline_mode<synchronous>, transform_indices = @transform_5, window_bounds = array<i64: 128, 128>}, {pipeline_mode = #tpu.pipeline_mode<synchronous>, transform_indices = @transform_6, window_bounds = array<i64: 1, 128>}, {transform_indices = @transform_7, window_bounds = array<i64: 128, 128>}]} {
    %c0 = arith.constant 0 : index
    %c0_0 = arith.constant 0 : index
    %0 = vector.load %arg1[%c0, %c0_0] : memref<128x1024xf32, #tpu.memory_space<vmem>>, vector<128x1024xf32>
    %1 = arith.truncf %0 : vector<128x1024xf32> to vector<128x1024xbf16>
    %c0_1 = arith.constant 0 : index
    %c0_2 = arith.constant 0 : index
    %2 = vector.load %arg2[%c0_1, %c0_2] : memref<1024x512xbf16, #tpu.memory_space<vmem>>, vector<1024x512xbf16>
    %cst = arith.constant dense<0.000000e+00> : vector<128x512xf32>
    %3 = tpu.matmul %1, %2, %cst {dimension_numbers = #tpu.dot_dimension_numbers<[1], [0], [0], [1], [0, 0, 1, 1], [], []>} : vector<128x1024xbf16>, vector<1024x512xbf16>, vector<128x512xf32> -> vector<128x512xf32>
    %c0_3 = arith.constant 0 : index
    %c0_4 = arith.constant 0 : index
    %4 = vector.load %arg3[%c0_3, %c0_4] : memref<1x512xf32, #tpu.memory_space<vmem>>, vector<1x512xf32>
    %5 = vector.broadcast %4 : vector<1x512xf32> to vector<128x512xf32>
    %6 = arith.addf %3, %5 : vector<128x512xf32>
    %cst_5 = arith.constant 0.000000e+00 : f32
    %7 = vector.broadcast %cst_5 : f32 to vector<128x512xf32>
    %8 = arith.maximumf %6, %7 : vector<128x512xf32>
    %9 = arith.truncf %8 : vector<128x512xf32> to vector<128x512xbf16>
    %c0_6 = arith.constant 0 : index
    %c0_7 = arith.constant 0 : index
    %10 = vector.load %arg4[%c0_6, %c0_7] : memref<512x128xbf16, #tpu.memory_space<vmem>>, vector<512x128xbf16>
    %cst_8 = arith.constant dense<0.000000e+00> : vector<128x128xf32>
    %11 = tpu.matmul %9, %10, %cst_8 {dimension_numbers = #tpu.dot_dimension_numbers<[1], [0], [0], [1], [0, 0, 1, 1], [], []>} : vector<128x512xbf16>, vector<512x128xbf16>, vector<128x128xf32> -> vector<128x128xf32>
    %c0_9 = arith.constant 0 : index
    %c0_10 = arith.constant 0 : index
    %12 = vector.load %arg5[%c0_9, %c0_10] : memref<1x128xf32, #tpu.memory_space<vmem>>, vector<1x128xf32>
    %13 = vector.broadcast %12 : vector<1x128xf32> to vector<128x128xf32>
    %14 = arith.addf %11, %13 : vector<128x128xf32>
    %cst_11 = arith.constant 0.000000e+00 : f32
    %15 = vector.broadcast %cst_11 : f32 to vector<128x128xf32>
    %16 = arith.maximumf %14, %15 : vector<128x128xf32>
    %17 = arith.truncf %16 : vector<128x128xf32> to vector<128x128xbf16>
    %c0_12 = arith.constant 0 : index
    %c0_13 = arith.constant 0 : index
    %18 = vector.load %arg6[%c0_12, %c0_13] : memref<128x128xbf16, #tpu.memory_space<vmem>>, vector<128x128xbf16>
    %cst_14 = arith.constant dense<0.000000e+00> : vector<128x128xf32>
    %19 = tpu.matmul %17, %18, %cst_14 {dimension_numbers = #tpu.dot_dimension_numbers<[1], [0], [0], [1], [0, 0, 1, 1], [], []>} : vector<128x128xbf16>, vector<128x128xbf16>, vector<128x128xf32> -> vector<128x128xf32>
    %c0_15 = arith.constant 0 : index
    %c0_16 = arith.constant 0 : index
    %20 = vector.load %arg7[%c0_15, %c0_16] : memref<1x128xf32, #tpu.memory_space<vmem>>, vector<1x128xf32>
    %21 = vector.broadcast %20 : vector<1x128xf32> to vector<128x128xf32>
    %22 = arith.addf %19, %21 : vector<128x128xf32>
    %23 = arith.truncf %22 : vector<128x128xf32> to vector<128x128xbf16>
    %c0_17 = arith.constant 0 : index
    %c0_18 = arith.constant 0 : index
    %24 = vector.load %arg8[%c0_17, %c0_18] : memref<128x128xbf16, #tpu.memory_space<vmem>>, vector<128x128xbf16>
    tpu.vector_store %arg8[%c0_17, %c0_18], %23 {strides = array<i32>} : memref<128x128xbf16, #tpu.memory_space<vmem>>, vector<128x128xbf16>,
    return
  }
  func.func @transform_0(%arg0: i32) -> (i32, i32) {
    %c0_i32 = arith.constant 0 : i32
    %c0_i32_0 = arith.constant 0 : i32
    return %arg0, %c0_i32 : i32, i32
  }
  func.func @transform_1(%arg0: i32) -> (i32, i32) {
    %c0_i32 = arith.constant 0 : i32
    %c0_i32_0 = arith.constant 0 : i32
    %c0_i32_1 = arith.constant 0 : i32
    return %c0_i32, %c0_i32_0 : i32, i32
  }
  func.func @transform_2(%arg0: i32) -> (i32, i32) {
    %c0_i32 = arith.constant 0 : i32
    %c0_i32_0 = arith.constant 0 : i32
    %c0_i32_1 = arith.constant 0 : i32
    return %c0_i32, %c0_i32_0 : i32, i32
  }
  func.func @transform_3(%arg0: i32) -> (i32, i32) {
    %c0_i32 = arith.constant 0 : i32
    %c0_i32_0 = arith.constant 0 : i32
    %c0_i32_1 = arith.constant 0 : i32
    return %c0_i32, %c0_i32_0 : i32, i32
  }
  func.func @transform_4(%arg0: i32) -> (i32, i32) {
    %c0_i32 = arith.constant 0 : i32
    %c0_i32_0 = arith.constant 0 : i32
    %c0_i32_1 = arith.constant 0 : i32
    return %c0_i32, %c0_i32_0 : i32, i32
  }
  func.func @transform_5(%arg0: i32) -> (i32, i32) {
    %c0_i32 = arith.constant 0 : i32
    %c0_i32_0 = arith.constant 0 : i32
    %c0_i32_1 = arith.constant 0 : i32
    return %c0_i32, %c0_i32_0 : i32, i32
  }
  func.func @transform_6(%arg0: i32) -> (i32, i32) {
    %c0_i32 = arith.constant 0 : i32
    %c0_i32_0 = arith.constant 0 : i32
    %c0_i32_1 = arith.constant 0 : i32
    return %c0_i32, %c0_i32_0 : i32, i32
  }
  func.func @transform_7(%arg0: i32) -> (i32, i32) {
    %c0_i32 = arith.constant 0 : i32
    %c0_i32_0 = arith.constant 0 : i32
    return %arg0, %c0_i32 : i32, i32
  }
}

</mosaic_0001>

<bundles_post_ra>
// kernel: fc_encoder.1
= control target key start
LH: loop header
LB: loop body
LE: loop exit
PB: predicated region body
PF: predicated region fallthrough
CT: control target
= control target key end

     0   :  { %12 = vsyncpa [#allocation3], 0  ;;  %s6179_s0 = inlined_call_operand.hbm [shape: f32[512,1024], index: 0, kind: input, shape index: {}]   ;;  %s6180_s1 = inlined_call_operand.hbm [shape: bf16[1024,512], index: 1, kind: input, shape index: {}]   ;;  %s6181_s2 = inlined_call_operand.hbm [shape: f32[1,512], index: 2, kind: input, shape index: {}]   ;;  %s6182_s3 = inlined_call_operand.hbm [shape: bf16[512,128], index: 3, kind: input, shape index: {}]   ;;  %s6183_s4 = inlined_call_operand.hbm [shape: f32[1,128], index: 4, kind: input, shape index: {}]   ;;  %s6184_s5 = inlined_call_operand.hbm [shape: bf16[128,128], index: 5, kind: input, shape index: {}]   ;;  %s6185_s6 = inlined_call_operand.hbm [shape: f32[1,128], index: 6, kind: input, shape index: {}]   ;;  %s6186_s7 = inlined_call_operand.vmem [shape: bf16[512,128], index: 7, kind: output, shape index: {}]  }
   0x1   :  { %14 = vsyncpa [#allocation3 + $0x1], 0 }
   0x2   :  { %15 = vsyncpa [#allocation5], 0 }
   0x3   :  { %16 = vsyncpa [#allocation8], 0 }
   0x4   :  { %17 = vsyncpa [#allocation11], 0  ;;  %s5667_s24 = smov 0   ;;  %s5669_s25 = smov 0  }
   0x5   :  { %s5671_s26 = smov 0   ;;  %s5673_s27 = smov 0  }
   0x6 LB: > { %s5615_s28 = smov [#allocation4]   ;;  %s6190_s30 = sadd.s32 4294967295, %s5613_s27   ;;  %s5613_s27 = sphi %s5673_s27, %s6204_s27   ;;  %s5609_s26 = sphi %s5671_s26, %s6203_s26   ;;  %s5605_s25 = sphi %s5669_s25, %s6202_s25   ;;  %s5601_s24 = sphi %s5667_s24, %s6201_s24  }
   0x7   : > { %s218_s29 = sshll.u32 %s5615_s28, 4  ;;  %p3989_p0 = scmp.ge.s32.totalorder %s5613_s27, 1  ;;  %s5696_s29 = int_to_ptr.vmem [resolvable:$true] %s218_s29 }
   0x8   : > { %p5691_p1 = scmp.eq.s32.totalorder %s6190_s30, 0  ;;  %p206_p2 = scmp.lt.s32.totalorder %s5613_s27, 5 }
   0x9   : > { %s5616_s10 = smov [#allocation7]   ;;  %s5617_s13 = smov [#allocation10]  }
   0xa   : > { %s6191_s8 = scalar_select %p5691_p1, 1, 0 }
   0xb   : > { %p5698_p3 = pnand %p3989_p0, %p206_p2  ;;  %s242_s11 = sshll.u32 %s5616_s10, 4  ;;  %s5710_s11 = int_to_ptr.vmem [resolvable:$true] %s242_s11 }
   0xc   : > { %s5712_s14 = sshll.u32 %s5617_s13, 4  ;;  %s5369_s17 = scalar_lea.hbm %s6180_s1, 32768  ;;  %s267_s14 = int_to_ptr.vmem [resolvable:$true] %s5712_s14 }
   0xd   : > { %s6192_s9 = scalar_select %p5698_p3, 1, 0 }
   0xe   : > { %p4866_p4 = pneg %p5698_p3  ;;  %p5370_p6 = scmp.ne.s32.totalorder %s6180_s1, %s5369_s17 }
   0xf   : > { %p5376_p10 = scmp.lt.u32.totalorder %s5369_s17, %s6180_s1 }
  0x10   : > { %p5706_p5 = pnand %p4866_p4, %p5691_p1 }
  0x12   : > { %p5722_p7 = pneg %p5706_p5 }
  0x14   : > { %p5372_p8 = pnand %p5722_p7, %p5370_p6 }
  0x16   : > { %p5373_p9 = pneg %p5372_p8 }
  0x18   : > { %p5378_p11 = pnand %p5376_p10, %p5373_p9 }
  0x1a   : > { %5381 = shalt.err (!%p5378_p11)
}
  0x1b   : > { %s5382_s23 = scalar_lea.vmem %s5696_s29, 32768  ;;  %p5390_p2 = scmp.lt.s32.totalorder %s5696_s29, %s5696_s29 }
  0x1c   : > { %p5383_p12 = scmp.ne.s32.totalorder %s5696_s29, %s5382_s23  ;;  %p5391_p4 = scmp.lt.s32.totalorder %s5382_s23, %s5382_s23 }
  0x1e   : > { %p5385_p13 = pnand %p5383_p12, %p5722_p7  ;;  %p5392_p6 = por %p5391_p4, %p5390_p2 }
  0x20   : > { %p5386_p0 = pneg %p5385_p13 }
  0x22   : > { %p5393_p8 = pnand %p5392_p6, %p5386_p0 }
  0x24   : > { %5396 = shalt.err (!%p5393_p8)
}
  0x25   : > { %s5618_s28 = smov 256   ;;  %s5619_s10 = smov 16  }
  0x26   : > { %4869 = dma.hbm_to_vmem [thread:$0]  (!%p5706_p5), %s6180_s1, 32768, %s5696_s29, [#allocation5], %s5618_s28, %s5618_s28, %s5619_s10  }
  0x27   : > { %s5397_s18 = scalar_lea.hbm %s6182_s3, 4096 }
  0x28   : > { %p5398_p9 = scmp.ne.s32.totalorder %s6182_s3, %s5397_s18  ;;  %p5404_p12 = scmp.lt.u32.totalorder %s5397_s18, %s6182_s3 }
  0x2a   : > { %p5400_p10 = pnand %p5398_p9, %p5722_p7 }
  0x2c   : > { %p5401_p11 = pneg %p5400_p10 }
  0x2e   : > { %p5406_p13 = pnand %p5404_p12, %p5401_p11 }
  0x30   : > { %5409 = shalt.err (!%p5406_p13)
}
  0x31   : > { %s5410_s29 = scalar_lea.vmem %s5710_s11, 4096  ;;  %p5418_p6 = scmp.lt.s32.totalorder %s5710_s11, %s5710_s11 }
  0x32   : > { %p5411_p0 = scmp.ne.s32.totalorder %s5710_s11, %s5410_s29  ;;  %p5419_p8 = scmp.lt.s32.totalorder %s5410_s29, %s5410_s29 }
  0x34   : > { %p5413_p2 = pnand %p5411_p0, %p5722_p7  ;;  %p5420_p9 = por %p5419_p8, %p5418_p6 }
  0x36   : > { %p5414_p4 = pneg %p5413_p2 }
  0x38   : > { %p5421_p10 = pnand %p5420_p9, %p5414_p4 }
  0x3a   : > { %5424 = shalt.err (!%p5421_p10)
}
  0x3b   : > { %s5620_s28 = smov 64   ;;  %s5621_s10 = smov 4  }
  0x3c   : > { %4875 = dma.hbm_to_vmem [thread:$0]  (!%p5706_p5), %s6182_s3, 4096, %s5710_s11, [#allocation8], %s5620_s28, %s5620_s28, %s5621_s10  }
  0x3d   : > { %s5425_s18 = scalar_lea.hbm %s6184_s5, 1024 }
  0x3e   : > { %p5426_p11 = scmp.ne.s32.totalorder %s6184_s5, %s5425_s18  ;;  %p5432_p0 = scmp.lt.u32.totalorder %s5425_s18, %s6184_s5 }
  0x40   : > { %p5428_p12 = pnand %p5426_p11, %p5722_p7 }
  0x42   : > { %p5429_p13 = pneg %p5428_p12 }
  0x44   : > { %p5434_p2 = pnand %p5432_p0, %p5429_p13 }
  0x46   : > { %5437 = shalt.err (!%p5434_p2)
}
  0x47   : > { %s5438_s29 = scalar_lea.vmem %s267_s14, 1024  ;;  %p5446_p9 = scmp.lt.s32.totalorder %s267_s14, %s267_s14 }
  0x48   : > { %p5439_p4 = scmp.ne.s32.totalorder %s267_s14, %s5438_s29  ;;  %p5447_p10 = scmp.lt.s32.totalorder %s5438_s29, %s5438_s29 }
  0x4a   : > { %p5441_p6 = pnand %p5439_p4, %p5722_p7  ;;  %p5448_p3 = por %p5447_p10, %p5446_p9 }
  0x4c   : > { %p5442_p8 = pneg %p5441_p6 }
  0x4e   : > { %p5449_p1 = pnand %p5448_p3, %p5442_p8 }
  0x50   : > { %5452 = shalt.err (!%p5449_p1)
}
  0x51   : > { %4881 = dma.hbm_to_vmem [thread:$0]  (!%p5706_p5), %s6184_s5, 1024, %s267_s14, [#allocation11], %s5620_s28, %s5620_s28, %s5621_s10  }
  0x52   : > { %s5622_s15 = smov [#allocation6]   ;;  %s5623_s17 = smov [#allocation9]  }
  0x53   : > { %s232_s16 = sshll.u32 %s5622_s15, 4  ;;  %s256_s18 = sshll.u32 %s5623_s17, 4  ;;  %s233_s16 = int_to_ptr.vmem [resolvable:$true] %s232_s16  ;;  %s257_s18 = int_to_ptr.vmem [resolvable:$true] %s256_s18 }
  0x54   : > { %s5453_s22 = scalar_lea.hbm %s6181_s2, 64 }
  0x55   : > { %p5454_p1 = scmp.ne.s32.totalorder %s6181_s2, %s5453_s22  ;;  %p5460_p12 = scmp.lt.u32.totalorder %s5453_s22, %s6181_s2 }
  0x57   : > { %p5456_p3 = pnand %p5454_p1, %p5722_p7 }
  0x59   : > { %p5457_p11 = pneg %p5456_p3 }
  0x5b   : > { %p5462_p13 = pnand %p5460_p12, %p5457_p11 }
  0x5d   : > { %5465 = shalt.err (!%p5462_p13)
}
  0x5e   : > { %s5466_s14 = scalar_lea.vmem %s233_s16, 64  ;;  %p5474_p6 = scmp.lt.s32.totalorder %s233_s16, %s233_s16 }
  0x5f   : > { %p5467_p0 = scmp.ne.s32.totalorder %s233_s16, %s5466_s14  ;;  %p5475_p8 = scmp.lt.s32.totalorder %s5466_s14, %s5466_s14 }
  0x61   : > { %p5469_p2 = pnand %p5467_p0, %p5722_p7  ;;  %p5476_p9 = por %p5475_p8, %p5474_p6 }
  0x63   : > { %p5470_p4 = pneg %p5469_p2 }
  0x65   : > { %p5477_p10 = pnand %p5476_p9, %p5470_p4 }
  0x67   : > { %5480 = shalt.err (!%p5477_p10)
}
  0x68   : > { %4872 = dma.hbm_to_vmem [thread:$0]  (!%p5706_p5), %s6181_s2, 64, %s233_s16, [#allocation5]  }
  0x69   : > { %s5481_s17 = scalar_lea.hbm %s6183_s4, 16 }
  0x6a   : > { %p5482_p1 = scmp.ne.s32.totalorder %s6183_s4, %s5481_s17  ;;  %p5488_p12 = scmp.lt.u32.totalorder %s5481_s17, %s6183_s4 }
  0x6c   : > { %p5484_p3 = pnand %p5482_p1, %p5722_p7 }
  0x6e   : > { %p5485_p11 = pneg %p5484_p3 }
  0x70   : > { %p5490_p13 = pnand %p5488_p12, %p5485_p11 }
  0x72   : > { %5493 = shalt.err (!%p5490_p13)
}
  0x73   : > { %s5494_s29 = scalar_lea.vmem %s257_s18, 16  ;;  %s5501_s16 = scalar_lea.vmem %s257_s18, 32 }
  0x74   : > { %p5495_p0 = scmp.ne.s32.totalorder %s257_s18, %s5494_s29  ;;  %p5502_p6 = scmp.lt.s32.totalorder %s257_s18, %s257_s18 }
  0x75   : > { %p5503_p8 = scmp.lt.s32.totalorder %s5501_s16, %s5494_s29 }
  0x76   : > { %p5497_p2 = pnand %p5495_p0, %p5722_p7 }
  0x77   : > { %p5504_p9 = por %p5503_p8, %p5502_p6 }
  0x78   : > { %p5498_p4 = pneg %p5497_p2 }
  0x7a   : > { %p5505_p10 = pnand %p5504_p9, %p5498_p4 }
  0x7c   : > { %5508 = shalt.err (!%p5505_p10)
}
  0x7d   : > { %4878 = dma.hbm_to_vmem [thread:$0]  (!%p5706_p5), %s6183_s4, 16, %s257_s18, [#allocation8]  }
  0x7e   : > { %s5624_s10 = smov [#allocation12]   ;;  %s5509_s17 = scalar_lea.hbm %s6185_s6, 16 }
  0x7f   : > { %s280_s13 = sshll.u32 %s5624_s10, 4  ;;  %p5510_p1 = scmp.ne.s32.totalorder %s6185_s6, %s5509_s17  ;;  %s281_s13 = int_to_ptr.vmem [resolvable:$true] %s280_s13 }
  0x80   : > { %p5516_p12 = scmp.lt.u32.totalorder %s5509_s17, %s6185_s6 }
  0x81   : > { %p5512_p3 = pnand %p5510_p1, %p5722_p7 }
  0x83   : > { %p5513_p11 = pneg %p5512_p3 }
  0x85   : > { %p5518_p13 = pnand %p5516_p12, %p5513_p11 }
  0x87   : > { %5521 = shalt.err (!%p5518_p13)
}
  0x88   : > { %s5522_s18 = scalar_lea.vmem %s281_s13, 16  ;;  %s5529_s29 = scalar_lea.vmem %s281_s13, 32 }
  0x89   : > { %p5523_p0 = scmp.ne.s32.totalorder %s281_s13, %s5522_s18  ;;  %p5530_p6 = scmp.lt.s32.totalorder %s281_s13, %s281_s13 }
  0x8a   : > { %p5531_p8 = scmp.lt.s32.totalorder %s5529_s29, %s5522_s18 }
  0x8b   : > { %p5525_p2 = pnand %p5523_p0, %p5722_p7 }
  0x8c   : > { %p5532_p9 = por %p5531_p8, %p5530_p6 }
  0x8d   : > { %p5526_p4 = pneg %p5525_p2 }
  0x8f   : > { %p5533_p10 = pnand %p5532_p9, %p5526_p4 }
  0x91   : > { %5536 = shalt.err (!%p5533_p10)
}
  0x92   : > { %4884 = dma.hbm_to_vmem [thread:$0]  (!%p5706_p5), %s6185_s6, 16, %s281_s13, [#allocation11]  }
  0x93   : > { %s5844_s20 = sadd.s32 1, %s5613_s27   ;;  %s30_s12 = sadd.s32 1, %s5609_s26 }
  0x94   : > { %s27_s14 = ssub.s32 %s5613_s27, %s5844_s20  ;;  %p37_p7 = scmp.ne.s32.totalorder %s5609_s26, %s5605_s25 }
  0x95   : > { %p28_p1 = scmp.eq.s32.totalorder %s27_s14, 0  ;;  %p38_p3 = scmp.eq.s32.totalorder %s5613_s27, 0 }
  0x96   : > { %p43_p11 = scmp.ne.s32.totalorder %s5605_s25, %s5601_s24  ;;  %p4895_p12 = scmp.lt.s32.totalorder %s5613_s27, 4 }
  0x97   : > { %s5856_s10 = scalar_select %p28_p1, %s5609_s26, %s30_s12  }
  0x98   : > { %p39_p13 = por %p38_p3, %p37_p7  ;;  %p6195_p0 = scmp.ne.s32.totalorder %s6191_s8, 0 }
  0x99   : > { %s291_s15 = sand.u32 1, %s5609_s26   ;;  %s4328_s13 = sshll.u32 %s5613_s27, 14 }
  0x9a   : > { %p5860_p2 = por %p6195_p0, %p43_p11  ;;  %s3997_s17 = sshll.u32 %s291_s15, 10 }
  0x9b   : > { %s5869_s22 = scalar_lea.hbm %s6179_s0, %s4328_s13  ;;  %s295_s24 = scalar_lea.vmem [#allocation2], %s3997_s17 }
  0x9c   : > { %s303_s23 = sshll.u32 %s295_s24, 4  ;;  %p5871_p5 = pnand %p4895_p12, %p39_p13  ;;  %s5875_s23 = int_to_ptr.vmem [resolvable:$true] %s303_s23 }
  0x9d   : > { %s5877_s29 = scalar_lea.sflag [#allocation3], %s291_s15  ;;  %s5537_s16 = scalar_lea.hbm %s5869_s22, 16384 }
  0x9e   : > { %p5538_p4 = scmp.ne.s32.totalorder %s5869_s22, %s5537_s16  ;;  %p5539_p6 = pneg %p5871_p5 }
  0x9f   : > { %s5542_s14 = scalar_lea.hbm %s6179_s0, 65536  ;;  %p5543_p10 = scmp.lt.u32.totalorder %s5869_s22, %s6179_s0 }
  0xa0   : > { %p5540_p8 = pnand %p5539_p6, %p5538_p4  ;;  %p5544_p7 = scmp.lt.u32.totalorder %s5542_s14, %s5537_s16 }
  0xa1   : > { %p5546_p3 = scmp.lt.u32.totalorder %s5537_s16, %s5869_s22 }
  0xa2   : > { %p5541_p9 = pneg %p5540_p8  ;;  %p5545_p1 = por %p5544_p7, %p5543_p10 }
  0xa4   : > { %p5547_p11 = por %p5546_p3, %p5545_p1 }
  0xa6   : > { %p5548_p12 = pnand %p5547_p11, %p5541_p9 }
  0xa8   : > { %5551 = shalt.err (!%p5548_p12)
}
  0xa9   : > { %s5552_s15 = scalar_lea.vmem %s5875_s23, 16384  ;;  %s5625_s19 = smov [#allocation2]  }
  0xaa   : > { %p5553_p13 = scmp.ne.s32.totalorder %s5875_s23, %s5552_s15  ;;  %s5557_s21 = sshll.u32 %s5625_s19, 4  ;;  %s5558_s21 = int_to_ptr.vmem [resolvable:$false] %s5557_s21 }
  0xab   : > { %s5559_s24 = scalar_lea.vmem %s5558_s21, 32768  ;;  %p5560_p8 = scmp.lt.s32.totalorder %s5875_s23, %s5558_s21 }
  0xac   : > { %p5555_p0 = pnand %p5553_p13, %p5539_p6  ;;  %p5561_p10 = scmp.lt.s32.totalorder %s5559_s24, %s5552_s15 }
  0xae   : > { %p5556_p4 = pneg %p5555_p0  ;;  %p5562_p7 = por %p5561_p10, %p5560_p8 }
  0xb0   : > { %p5563_p1 = pnand %p5562_p7, %p5556_p4 }
  0xb2   : > { %5566 = shalt.err (!%p5563_p1)
}
  0xb3   : > { %s5626_s16 = smov 1024   ;;  %p6198_p6 = scmp.ne.s32.totalorder %s6192_s9, 0 }
  0xb4   : > { %4888 = dma.hbm_to_vmem [thread:$0]  (!%p5871_p5), %s5869_s22, 16384, %s5875_s23, %s5877_s29, %s5626_s16, %s5626_s16, %s5620_s28  }
  0xb5   : > { %315 = sbr.rel (%p6198_p6) target bundleno = 1176 (0x498), region = 48  ;;  %s317_s11 = sand.u32 (!%p6198_p6), 1, %s5605_s25  }
  0xb6   : > { %s4002_s12 = sshll.u32 (!%p6198_p6), %s317_s11, 10  ;;  %s318_s14 = scalar_lea.sflag (!%p6198_p6), [#allocation3], %s317_s11 }
  0xb7   : > { %s5909_s13 = scalar_lea.vmem (!%p6198_p6), [#allocation2], %s4002_s12 }
  0xbc   : > { %5584 = dma.done.wait (%p5860_p2), %s318_s14, 16384  }
  0xbd   : > { %5586 = vsyncadd (%p5860_p2), %s318_s14, 4294950912  ;;  %p6199_p9 = scmp.ne.s32.totalorder %s6191_s8, 0 }
  0xbf   : > { %5588 = dma.done.wait (%p6199_p9), [#allocation5], 32832  }
  0xc0   : > { %5590 = vsyncadd (%p6199_p9), [#allocation5], 4294934464 }
  0xc1   : > { %5592 = dma.done.wait (%p6199_p9), [#allocation8], 4112  }
  0xc2   : > { %5594 = vsyncadd (%p6199_p9), [#allocation8], 4294963184 }
  0xc3   : > { %5596 = dma.done.wait (%p6199_p9), [#allocation11], 1040  }
  0xc4   : > { %5598 = vsyncadd (%p6199_p9), [#allocation11], 4294966256  ;;  %v4945_v0 = vld [vmem:[#allocation4 + $0x4] ss:$16 sps:$4 sm:$0xff]   ;;  %v4947_v1 = vld [vmem:[#allocation4 + $0xc] ss:$16 sps:$4 sm:$0xff]  }
  0xc5   : > { %2134 = vmatprep.subr.bf16.mxu0 %v4945_v0  ;;  %v4949_v2 = vld [vmem:[#allocation4] ss:$16 sps:$4 sm:$0xff]   ;;  %v4950_v3 = vld [vmem:[#allocation4 + $0x8] ss:$16 sps:$4 sm:$0xff]   ;;  %2586 = vmatprep.subr.bf16.mxu1 %v4947_v1  ;;  %v4951_v4 = vld [vmem:[#allocation4 + $0x24] ss:$16 sps:$4 sm:$0xff]  }
  0xc6   : > { %2135 = vmatpush1.bf16.msra.mxu0 %v4949_v2  ;;  %2587 = vmatpush1.bf16.msra.mxu1 %v4950_v3  ;;  %v4953_v5 = vld [vmem:[#allocation4 + $0x2c] ss:$16 sps:$4 sm:$0xff]   ;;  %v4955_v6 = vld [vmem:[#allocation4 + $0x20] ss:$16 sps:$4 sm:$0xff]   ;;  %v4956_v7 = vld [vmem:[#allocation4 + $0x28] ss:$16 sps:$4 sm:$0xff]  }
  0xc7   : > { %2136 = vmatprep.subr.bf16.mxu0 %v4951_v4  ;;  %2588 = vmatprep.subr.bf16.mxu1 %v4953_v5  ;;  %v4957_v8 = vld [vmem:[#allocation4 + $0x44] ss:$16 sps:$4 sm:$0xff]   ;;  %v4959_v9 = vld [vmem:[#allocation4 + $0x4c] ss:$16 sps:$4 sm:$0xff]   ;;  %v4961_v10 = vld [vmem:[#allocation4 + $0x40] ss:$16 sps:$4 sm:$0xff]  }
  0xc8   : > { %v4962_v11 = vld [vmem:[#allocation4 + $0x48] ss:$16 sps:$4 sm:$0xff]   ;;  %v4963_v12 = vld [vmem:[#allocation4 + $0x64] ss:$16 sps:$4 sm:$0xff]   ;;  %v4965_v13 = vld [vmem:[#allocation4 + $0x6c] ss:$16 sps:$4 sm:$0xff]  }
  0xc9   : > { %v4967_v14 = vld [vmem:[#allocation4 + $0x60] ss:$16 sps:$4 sm:$0xff]   ;;  %v4968_v15 = vld [vmem:[#allocation4 + $0x68] ss:$16 sps:$4 sm:$0xff]   ;;  %v4969_v16 = vld [vmem:[#allocation4 + $0x84] ss:$16 sps:$4 sm:$0xff]  }
  0xca   : > { %2137 = vmatpush1.bf16.msra.mxu0 %v4955_v6  ;;  %2589 = vmatpush1.bf16.msra.mxu1 %v4956_v7  ;;  %v4971_v17 = vld [vmem:[#allocation4 + $0x8c] ss:$16 sps:$4 sm:$0xff]   ;;  %v4973_v18 = vld [vmem:[#allocation4 + $0x80] ss:$16 sps:$4 sm:$0xff]   ;;  %v4974_v19 = vld [vmem:[#allocation4 + $0x88] ss:$16 sps:$4 sm:$0xff]  }
  0xcb   : > { %2138 = vmatprep.subr.bf16.mxu0 %v4957_v8  ;;  %2590 = vmatprep.subr.bf16.mxu1 %v4959_v9  ;;  %v4975_v20 = vld [vmem:[#allocation4 + $0xa4] ss:$16 sps:$4 sm:$0xff]   ;;  %v4977_v21 = vld [vmem:[#allocation4 + $0xac] ss:$16 sps:$4 sm:$0xff]   ;;  %v4979_v22 = vld [vmem:[#allocation4 + $0xa0] ss:$16 sps:$4 sm:$0xff]  }
  0xcc   : > { %v4980_v23 = vld [vmem:[#allocation4 + $0xa8] ss:$16 sps:$4 sm:$0xff]   ;;  %v4981_v24 = vld [vmem:[#allocation4 + $0xc4] ss:$16 sps:$4 sm:$0xff]   ;;  %v4983_v25 = vld [vmem:[#allocation4 + $0xcc] ss:$16 sps:$4 sm:$0xff]  }
  0xcd   : > { %v4985_v26 = vld [vmem:[#allocation4 + $0xc0] ss:$16 sps:$4 sm:$0xff]   ;;  %v4986_v27 = vld [vmem:[#allocation4 + $0xc8] ss:$16 sps:$4 sm:$0xff]   ;;  %v4987_v28 = vld [vmem:[#allocation4 + $0xe4] ss:$16 sps:$4 sm:$0xff]  }
  0xce   : > { %2139 = vmatpush1.bf16.msra.mxu0 %v4961_v10  ;;  %2591 = vmatpush1.bf16.msra.mxu1 %v4962_v11  ;;  %v4989_v29 = vld [vmem:[#allocation4 + $0xec] ss:$16 sps:$4 sm:$0xff]   ;;  %v4991_v30 = vld [vmem:[#allocation4 + $0xe0] ss:$16 sps:$4 sm:$0xff]   ;;  %v4992_v31 = vld [vmem:[#allocation4 + $0xe8] ss:$16 sps:$4 sm:$0xff]  }
  0xcf   : > { %2140 = vmatprep.subr.bf16.mxu0 %v4963_v12  ;;  %2592 = vmatprep.subr.bf16.mxu1 %v4965_v13  ;;  %v4993_v32 = vld [vmem:[#allocation4 + $0x104] ss:$16 sps:$4 sm:$0xff]   ;;  %v4995_v33 = vld [vmem:[#allocation4 + $0x10c] ss:$16 sps:$4 sm:$0xff]   ;;  %v4997_v34 = vld [vmem:[#allocation4 + $0x100] ss:$16 sps:$4 sm:$0xff]  }
  0xd0   : > { %v4998_v35 = vld [vmem:[#allocation4 + $0x108] ss:$16 sps:$4 sm:$0xff]   ;;  %v4999_v36 = vld [vmem:[#allocation4 + $0x124] ss:$16 sps:$4 sm:$0xff]   ;;  %v5001_v37 = vld [vmem:[#allocation4 + $0x12c] ss:$16 sps:$4 sm:$0xff]  }
  0xd1   : > { %v5003_v38 = vld [vmem:[#allocation4 + $0x120] ss:$16 sps:$4 sm:$0xff]   ;;  %v5004_v39 = vld [vmem:[#allocation4 + $0x128] ss:$16 sps:$4 sm:$0xff]   ;;  %v5005_v40 = vld [vmem:[#allocation4 + $0x144] ss:$16 sps:$4 sm:$0xff]  }
  0xd2   : > { %2141 = vmatpush1.bf16.msra.mxu0 %v4967_v14  ;;  %2593 = vmatpush1.bf16.msra.mxu1 %v4968_v15  ;;  %v5007_v41 = vld [vmem:[#allocation4 + $0x14c] ss:$16 sps:$4 sm:$0xff]   ;;  %v5009_v42 = vld [vmem:[#allocation4 + $0x140] ss:$16 sps:$4 sm:$0xff]   ;;  %v5010_v43 = vld [vmem:[#allocation4 + $0x148] ss:$16 sps:$4 sm:$0xff]  }
  0xd3   : > { %2142 = vmatprep.subr.bf16.mxu0 %v4969_v16  ;;  %2594 = vmatprep.subr.bf16.mxu1 %v4971_v17  ;;  %v5011_v44 = vld [vmem:[#allocation4 + $0x164] ss:$16 sps:$4 sm:$0xff]   ;;  %v5013_v45 = vld [vmem:[#allocation4 + $0x16c] ss:$16 sps:$4 sm:$0xff]   ;;  %v5015_v47 = vld [vmem:[#allocation4 + $0x160] ss:$16 sps:$4 sm:$0xff]  }
  0xd4   : > { %v385_v46 = vld [vmem:[%s5909_s13 + $0x8] sm:$0xff]  ;;  %v5017_v50 = vld [vmem:[#allocation4 + $0x184] ss:$16 sps:$4 sm:$0xff]   ;;  %v5021_v53 = vld [vmem:[#allocation4 + $0x180] ss:$16 sps:$4 sm:$0xff]   ;;  %s6200_s8 = sadd.s32 4294967295, %s5613_s27  }
  0xd5   : > { %v5016_v48 = vld [vmem:[#allocation4 + $0x168] ss:$16 sps:$4 sm:$0xff]   ;;  %v5019_v52 = vld [vmem:[#allocation4 + $0x18c] ss:$16 sps:$4 sm:$0xff]   ;;  %v5023_v55 = vld [vmem:[#allocation4 + $0x1a4] ss:$16 sps:$4 sm:$0xff]  }
  0xd6   : > { %2143 = vmatpush1.bf16.msra.mxu0 %v4973_v18  ;;  %2595 = vmatpush1.bf16.msra.mxu1 %v4974_v19  ;;  %v393_v49 = vld [vmem:[%s5909_s13 + $0x48] sm:$0xff]  ;;  %v5027_v57 = vld [vmem:[#allocation4 + $0x1a0] ss:$16 sps:$4 sm:$0xff]   ;;  %v5029_v59 = vld [vmem:[#allocation4 + $0x1c4] ss:$16 sps:$4 sm:$0xff]   ;;  %s4009_s9 = sshll.u32 %s6200_s8, 4 }
  0xd7   : > { %2144 = vmatprep.subr.bf16.mxu0 %v4975_v20  ;;  %2596 = vmatprep.subr.bf16.mxu1 %v4977_v21  ;;  %v513_v51 = vpack.c.bf16 %v393_v49, %v385_v46  ;;  %v5022_v54 = vld [vmem:[#allocation4 + $0x188] ss:$16 sps:$4 sm:$0xff]   ;;  %v5025_v56 = vld [vmem:[#allocation4 + $0x1ac] ss:$16 sps:$4 sm:$0xff]   ;;  %v5033_v61 = vld [vmem:[#allocation4 + $0x1c0] ss:$16 sps:$4 sm:$0xff]  }
  0xd8   : > { %v5028_v58 = vld [vmem:[#allocation4 + $0x1a8] ss:$16 sps:$4 sm:$0xff]   ;;  %v5031_v60 = vld [vmem:[#allocation4 + $0x1cc] ss:$16 sps:$4 sm:$0xff]   ;;  %v5035_v63 = vld [vmem:[#allocation4 + $0x1e4] ss:$16 sps:$4 sm:$0xff]  }
  0xd9   : > { %2166 = vmatprep.mubr.bf16.mxu0 %v513_v51  ;;  %2618 = vmatprep.mubr.bf16.mxu1 %v513_v51  ;;  %v5034_v62 = vld [vmem:[#allocation4 + $0x1c8] ss:$16 sps:$4 sm:$0xff]   ;;  %v5037_v0 = vld [vmem:[#allocation4 + $0x1ec] ss:$16 sps:$4 sm:$0xff]   ;;  %v5039_v1 = vld [vmem:[#allocation4 + $0x1e0] ss:$16 sps:$4 sm:$0xff]  }
  0xda   : > { %2145 = vmatpush1.bf16.msra.mxu0 %v4979_v22  ;;  %2597 = vmatpush1.bf16.msra.mxu1 %v4980_v23  ;;  %v5040_v2 = vld [vmem:[#allocation4 + $0x1e8] ss:$16 sps:$4 sm:$0xff]   ;;  %v384_v3 = vld [vmem:[%s5909_s13] sm:$0xff]  ;;  %v5046_v6 = vld [vmem:[#allocation4 + $0x20c] ss:$16 sps:$4 sm:$0xff]   ;;  %p378_p2 = scmp.lt.s32.totalorder %s4009_s9, 63 }
  0xdb   : > { %2146 = vmatprep.subr.bf16.mxu0 %v4981_v24  ;;  %2598 = vmatprep.subr.bf16.mxu1 %v4983_v25  ;;  %v392_v4 = vld [vmem:[%s5909_s13 + $0x40] sm:$0xff]  ;;  %v5044_v9 = vld [vmem:[#allocation4 + $0x208] ss:$16 sps:$4 sm:$0xff]   ;;  %v5052_v13 = vld [vmem:[#allocation4 + $0x22c] ss:$16 sps:$4 sm:$0xff]  }
  0xdc   : > { %v5043_v5 = vld [vmem:[#allocation4 + $0x204] ss:$16 sps:$4 sm:$0xff]   ;;  %v5041_v7 = vld [vmem:[#allocation4 + $0x200] ss:$16 sps:$4 sm:$0xff]   ;;  %v512_v8 = vpack.c.bf16 %v392_v4, %v384_v3  ;;  %v401_v10 = vld [vmem:[%s5909_s13 + $0x88] sm:$0xff]  ;;  %s6206_s9 = smov (!%p378_p2, %s4009_s9), 63 }
  0xdd   : > { %v409_v11 = vld [vmem:[%s5909_s13 + $0xc8] sm:$0xff]  ;;  %v5049_v12 = vld [vmem:[#allocation4 + $0x224] ss:$16 sps:$4 sm:$0xff]   ;;  %v5047_v14 = vld [vmem:[#allocation4 + $0x220] ss:$16 sps:$4 sm:$0xff]   ;;  %s4010_s28 = sshll.u32 %s6206_s9, 2 }
  0xde   : > { %2147 = vmatpush1.bf16.msra.mxu0 %v4985_v26  ;;  %2599 = vmatpush1.bf16.msra.mxu1 %v4986_v27  ;;  %v521_v15 = vpack.c.bf16 %v409_v11, %v401_v10  ;;  %v5050_v16 = vld [vmem:[#allocation4 + $0x228] ss:$16 sps:$4 sm:$0xff]   ;;  %v400_v17 = vld [vmem:[%s5909_s13 + $0x80] sm:$0xff]  ;;  %v5058_v20 = vld [vmem:[#allocation4 + $0x24c] ss:$16 sps:$4 sm:$0xff]   ;;  %s6156_s23 = scalar_lea.vmem %s6186_s7, %s4010_s28 }
  0xdf   : > { %2148 = vmatprep.subr.bf16.mxu0 %v4987_v28  ;;  %2600 = vmatprep.subr.bf16.mxu1 %v4989_v29  ;;  %v408_v18 = vld [vmem:[%s5909_s13 + $0xc0] sm:$0xff]  ;;  %v5056_v22 = vld [vmem:[#allocation4 + $0x248] ss:$16 sps:$4 sm:$0xff]   ;;  %v5064_v27 = vld [vmem:[#allocation4 + $0x26c] ss:$16 sps:$4 sm:$0xff]  }
  0xe0   : > { %v5055_v19 = vld [vmem:[#allocation4 + $0x244] ss:$16 sps:$4 sm:$0xff]   ;;  %v5053_v21 = vld [vmem:[#allocation4 + $0x240] ss:$16 sps:$4 sm:$0xff]   ;;  %v520_v23 = vpack.c.bf16 %v408_v18, %v400_v17  ;;  %v417_v24 = vld [vmem:[%s5909_s13 + $0x108] sm:$0xff] }
  0xe1   : > { %v425_v25 = vld [vmem:[%s5909_s13 + $0x148] sm:$0xff]  ;;  %v5061_v26 = vld [vmem:[#allocation4 + $0x264] ss:$16 sps:$4 sm:$0xff]   ;;  %v5059_v29 = vld [vmem:[#allocation4 + $0x260] ss:$16 sps:$4 sm:$0xff]  }
  0xe2   : > { %2149 = vmatpush1.bf16.msra.mxu0 %v4991_v30  ;;  %2601 = vmatpush1.bf16.msra.mxu1 %v4992_v31  ;;  %v529_v28 = vpack.c.bf16 %v425_v25, %v417_v24  ;;  %v5062_v30 = vld [vmem:[#allocation4 + $0x268] ss:$16 sps:$4 sm:$0xff]   ;;  %v416_v31 = vld [vmem:[%s5909_s13 + $0x100] sm:$0xff] }
  0xe3   : > { %2150 = vmatprep.subr.bf16.mxu0 %v4993_v32  ;;  %2602 = vmatprep.subr.bf16.mxu1 %v4995_v33  ;;  %v424_v32 = vld [vmem:[%s5909_s13 + $0x140] sm:$0xff]  ;;  %v449_v51 = vld [vmem:[%s5909_s13 + $0x208] sm:$0xff] }
  0xe4   : > { %v5067_v33 = vld [vmem:[#allocation4 + $0x284] ss:$16 sps:$4 sm:$0xff]   ;;  %v5077_v49 = vld [vmem:[#allocation4 + $0x2c0] ss:$16 sps:$4 sm:$0xff]   ;;  %v5092_v3 = vld [vmem:[#allocation4 + $0x308] ss:$16 sps:$4 sm:$0xff]  }
  0xe5   : > { %v440_v46 = vld [vmem:[%s5909_s13 + $0x1c0] sm:$0xff]  ;;  %v489_v17 = vld [vmem:[%s5909_s13 + $0x348] sm:$0xff] }
  0xe6   : > { %2151 = vmatpush1.bf16.msra.mxu0 %v4997_v34  ;;  %2603 = vmatpush1.bf16.msra.mxu1 %v4998_v35  ;;  %v5070_v34 = vld [vmem:[#allocation4 + $0x28c] ss:$16 sps:$4 sm:$0xff]   ;;  %v5065_v35 = vld [vmem:[#allocation4 + $0x280] ss:$16 sps:$4 sm:$0xff]   ;;  %v5097_v4 = vld [vmem:[#allocation4 + $0x324] ss:$16 sps:$4 sm:$0xff]  }
  0xe7   : > { %2152 = vmatprep.subr.bf16.mxu0 %v4999_v36  ;;  %2604 = vmatprep.subr.bf16.mxu1 %v5001_v37  ;;  %v5068_v36 = vld [vmem:[#allocation4 + $0x288] ss:$16 sps:$4 sm:$0xff]   ;;  %v528_v37 = vpack.c.bf16 %v424_v32, %v416_v31  ;;  %v472_v10 = vld [vmem:[%s5909_s13 + $0x2c0] sm:$0xff] }
  0xe8   : > { %v5103_v11 = vld [vmem:[#allocation4 + $0x344] ss:$16 sps:$4 sm:$0xff]   ;;  %v505_v31 = vld [vmem:[%s5909_s13 + $0x3c8] sm:$0xff] }
  0xe9   : > { %v5109_v18 = vld [vmem:[#allocation4 + $0x364] ss:$16 sps:$4 sm:$0xff]  }
  0xea   : > { %2153 = vmatpush1.bf16.msra.mxu0 %v5003_v38  ;;  %2605 = vmatpush1.bf16.msra.mxu1 %v5004_v39  ;;  %v433_v38 = vld [vmem:[%s5909_s13 + $0x188] sm:$0xff]  ;;  %v488_v24 = vld [vmem:[%s5909_s13 + $0x340] sm:$0xff] }
  0xeb   : > { %2154 = vmatprep.subr.bf16.mxu0 %v5005_v40  ;;  %2606 = vmatprep.subr.bf16.mxu1 %v5007_v41  ;;  %v441_v39 = vld [vmem:[%s5909_s13 + $0x1c8] sm:$0xff]  ;;  %v5073_v40 = vld [vmem:[#allocation4 + $0x2a4] ss:$16 sps:$4 sm:$0xff]  }
  0xec   : > { %v5076_v41 = vld [vmem:[#allocation4 + $0x2ac] ss:$16 sps:$4 sm:$0xff]   ;;  %v5115_v25 = vld [vmem:[#allocation4 + $0x384] ss:$16 sps:$4 sm:$0xff]  }
  0xed   : > { %v5121_v32 = vld [vmem:[#allocation4 + $0x3a4] ss:$16 sps:$4 sm:$0xff]  }
  0xee   : > { %2155 = vmatpush1.bf16.msra.mxu0 %v5009_v42  ;;  %2607 = vmatpush1.bf16.msra.mxu1 %v5010_v43  ;;  %v5071_v42 = vld [vmem:[#allocation4 + $0x2a0] ss:$16 sps:$4 sm:$0xff]   ;;  %v537_v43 = vpack.c.bf16 %v441_v39, %v433_v38  ;;  %v5127_v39 = vld [vmem:[#allocation4 + $0x3c4] ss:$16 sps:$4 sm:$0xff]  }
  0xef   : > { %2156 = vmatprep.subr.bf16.mxu0 %v5011_v44  ;;  %2608 = vmatprep.subr.bf16.mxu1 %v5013_v45  ;;  %v5074_v44 = vld [vmem:[#allocation4 + $0x2a8] ss:$16 sps:$4 sm:$0xff]   ;;  %v432_v45 = vld [vmem:[%s5909_s13 + $0x180] sm:$0xff] }
  0xf0   : > { %v504_v38 = vld [vmem:[%s5909_s13 + $0x3c0] sm:$0xff] }
  0xf2   : > { %2157 = vmatpush1.bf16.msra.mxu0 %v5015_v47  ;;  %2609 = vmatpush1.bf16.msra.mxu1 %v5016_v48  ;;  %v5079_v47 = vld [vmem:[#allocation4 + $0x2c4] ss:$16 sps:$4 sm:$0xff]   ;;  %v5082_v48 = vld [vmem:[#allocation4 + $0x2cc] ss:$16 sps:$4 sm:$0xff]  }
  0xf3   : > { %2158 = vmatprep.subr.bf16.mxu0 %v5017_v50  ;;  %2610 = vmatprep.subr.bf16.mxu1 %v5019_v52  ;;  %v536_v50 = vpack.c.bf16 %v440_v46, %v432_v45  ;;  %v457_v52 = vld [vmem:[%s5909_s13 + $0x248] sm:$0xff]  ;;  %v395_v45 = vld [vmem:[%s5909_s13 + $0x58] sm:$0xff]  ;;  %v5133_v46 = vld [vmem:[#allocation4 + $0x3e4] ss:$16 sps:$4 sm:$0xff]  }
  0xf6   : > { %2159 = vmatpush1.bf16.msra.mxu0 %v5021_v53  ;;  %2611 = vmatpush1.bf16.msra.mxu1 %v5022_v54  ;;  %v5080_v53 = vld [vmem:[#allocation4 + $0x2c8] ss:$16 sps:$4 sm:$0xff]   ;;  %v5085_v54 = vld [vmem:[#allocation4 + $0x2e4] ss:$16 sps:$4 sm:$0xff]  }
  0xf7   : > { %2160 = vmatprep.subr.bf16.mxu0 %v5023_v55  ;;  %2612 = vmatprep.subr.bf16.mxu1 %v5025_v56  ;;  %v5088_v55 = vld [vmem:[#allocation4 + $0x2ec] ss:$16 sps:$4 sm:$0xff]   ;;  %v5083_v56 = vld [vmem:[#allocation4 + $0x2e0] ss:$16 sps:$4 sm:$0xff]  }
  0xfa   : > { %2161 = vmatpush1.bf16.msra.mxu0 %v5027_v57  ;;  %2613 = vmatpush1.bf16.msra.mxu1 %v5028_v58  ;;  %v5086_v57 = vld [vmem:[#allocation4 + $0x2e8] ss:$16 sps:$4 sm:$0xff]   ;;  %v545_v58 = vpack.c.bf16 %v457_v52, %v449_v51  ;;  %v386_v51 = vld [vmem:[%s5909_s13 + $0x10] sm:$0xff] }
  0xfb   : > { %2162 = vmatprep.subr.bf16.mxu0 %v5029_v59  ;;  %2614 = vmatprep.subr.bf16.mxu1 %v5031_v60  ;;  %v448_v59 = vld [vmem:[%s5909_s13 + $0x200] sm:$0xff]  ;;  %v394_v52 = vld [vmem:[%s5909_s13 + $0x50] sm:$0xff] }
  0xfc   : > { %v456_v60 = vld [vmem:[%s5909_s13 + $0x240] sm:$0xff] }
  0xfe   : > { %2163 = vmatpush1.bf16.msra.mxu0 %v5033_v61  ;;  %2615 = vmatpush1.bf16.msra.mxu1 %v5034_v62  ;;  %v5091_v61 = vld [vmem:[#allocation4 + $0x304] ss:$16 sps:$4 sm:$0xff]   ;;  %v5094_v62 = vld [vmem:[#allocation4 + $0x30c] ss:$16 sps:$4 sm:$0xff]  }
  0xff   : > { %2164 = vmatprep.subr.bf16.mxu0 %v5035_v63  ;;  %2616 = vmatprep.subr.bf16.mxu1 %v5037_v0  ;;  %v544_v63 = vpack.c.bf16 %v456_v60, %v448_v59  ;;  %v465_v0 = vld [vmem:[%s5909_s13 + $0x288] sm:$0xff]  ;;  %v5145_v60 = vld [vmem:[#allocation4 + $0x424] ss:$16 sps:$4 sm:$0xff]  }
 0x100   : > { %v5140_v59 = vld [vmem:[#allocation4 + $0x408] ss:$16 sps:$4 sm:$0xff]  }
 0x102   : > { %2165 = vmatpush1.bf16.msra.mxu0 %v5039_v1  ;;  %2617 = vmatpush1.bf16.msra.mxu1 %v5040_v2  ;;  %v473_v1 = vld [vmem:[%s5909_s13 + $0x2c8] sm:$0xff]  ;;  %v5089_v2 = vld [vmem:[#allocation4 + $0x300] ss:$16 sps:$4 sm:$0xff]  }
 0x103   : > { %2247 = vmatprep.subr.bf16.mxu0 %v5043_v5  ;;  %2699 = vmatprep.subr.bf16.mxu1 %v5046_v6  ;;  %v5100_v5 = vld [vmem:[#allocation4 + $0x32c] ss:$16 sps:$4 sm:$0xff]   ;;  %v5095_v6 = vld [vmem:[#allocation4 + $0x320] ss:$16 sps:$4 sm:$0xff]  }
 0x105   : > { %2167 = vmatmul.mubr.bf16.vlgmr.msra.gmra.mrb[0].mxu0 %v512_v8  ;;  %2619 = vmatmul.mubr.bf16.vlgmr.msra.gmra.mrb[0].mxu1 %v512_v8  ;;  %v553_v8 = vpack.c.bf16 %v473_v1, %v465_v0  ;;  %v402_v1 = vld [vmem:[%s5909_s13 + $0x90] sm:$0xff] }
 0x106   : > { %2248 = vmatpush1.bf16.msra.mxu0 %v5041_v7  ;;  %2700 = vmatpush1.bf16.msra.mxu1 %v5044_v9  ;;  %v5098_v7 = vld [vmem:[#allocation4 + $0x328] ss:$16 sps:$4 sm:$0xff]   ;;  %v464_v9 = vld [vmem:[%s5909_s13 + $0x280] sm:$0xff] }
 0x107   : > { %2249 = vmatprep.subr.bf16.mxu0 %v5049_v12  ;;  %2701 = vmatprep.subr.bf16.mxu1 %v5052_v13  ;;  %v5106_v12 = vld [vmem:[#allocation4 + $0x34c] ss:$16 sps:$4 sm:$0xff]   ;;  %v5101_v13 = vld [vmem:[#allocation4 + $0x340] ss:$16 sps:$4 sm:$0xff]  }
 0x108   : > { %2176 = vmatprep.mubr.bf16.mxu0 %v521_v15  ;;  %2628 = vmatprep.mubr.bf16.mxu1 %v521_v15  ;;  %v5104_v15 = vld [vmem:[#allocation4 + $0x348] ss:$16 sps:$4 sm:$0xff]  }
 0x10a   : > { %2250 = vmatpush1.bf16.msra.mxu0 %v5047_v14  ;;  %2702 = vmatpush1.bf16.msra.mxu1 %v5050_v16  ;;  %v552_v14 = vpack.c.bf16 %v472_v10, %v464_v9  ;;  %v481_v16 = vld [vmem:[%s5909_s13 + $0x308] sm:$0xff]  ;;  %v5157_v10 = vld [vmem:[#allocation4 + $0x464] ss:$16 sps:$4 sm:$0xff]  }
 0x10b   : > { %2251 = vmatprep.subr.bf16.mxu0 %v5055_v19  ;;  %2703 = vmatprep.subr.bf16.mxu1 %v5058_v20  ;;  %v5112_v19 = vld [vmem:[#allocation4 + $0x36c] ss:$16 sps:$4 sm:$0xff]   ;;  %v5107_v20 = vld [vmem:[#allocation4 + $0x360] ss:$16 sps:$4 sm:$0xff]   ;;  %v5152_v9 = vld [vmem:[#allocation4 + $0x448] ss:$16 sps:$4 sm:$0xff]  }
 0x10d   : > { %2177 = vmatmul.mubr.bf16.gmra.mrb[4].mxu0 %v520_v23  ;;  %2629 = vmatmul.mubr.bf16.gmra.mrb[4].mxu1 %v520_v23  ;;  %v480_v23 = vld [vmem:[%s5909_s13 + $0x300] sm:$0xff] }
 0x10e   : > { %2252 = vmatpush1.bf16.msra.mxu0 %v5053_v21  ;;  %2704 = vmatpush1.bf16.msra.mxu1 %v5056_v22  ;;  %v561_v21 = vpack.c.bf16 %v489_v17, %v481_v16  ;;  %v5110_v22 = vld [vmem:[#allocation4 + $0x368] ss:$16 sps:$4 sm:$0xff]   ;;  %v426_v16 = vld [vmem:[%s5909_s13 + $0x150] sm:$0xff] }
 0x10f   : > { %2253 = vmatprep.subr.bf16.mxu0 %v5061_v26  ;;  %2705 = vmatprep.subr.bf16.mxu1 %v5064_v27  ;;  %v5118_v26 = vld [vmem:[#allocation4 + $0x38c] ss:$16 sps:$4 sm:$0xff]   ;;  %v5113_v27 = vld [vmem:[#allocation4 + $0x380] ss:$16 sps:$4 sm:$0xff]   ;;  %v5163_v17 = vld [vmem:[#allocation4 + $0x484] ss:$16 sps:$4 sm:$0xff]  }
 0x110   : > { %2186 = vmatprep.mubr.bf16.mxu0 %v529_v28  ;;  %2638 = vmatprep.mubr.bf16.mxu1 %v529_v28  ;;  %v5116_v28 = vld [vmem:[#allocation4 + $0x388] ss:$16 sps:$4 sm:$0xff]  }
 0x112   : > { %2254 = vmatpush1.bf16.msra.mxu0 %v5059_v29  ;;  %2706 = vmatpush1.bf16.msra.mxu1 %v5062_v30  ;;  %v560_v29 = vpack.c.bf16 %v488_v24, %v480_v23  ;;  %v497_v30 = vld [vmem:[%s5909_s13 + $0x388] sm:$0xff]  ;;  %v443_v23 = vld [vmem:[%s5909_s13 + $0x1d8] sm:$0xff]  ;;  %v5169_v24 = vld [vmem:[#allocation4 + $0x4a4] ss:$16 sps:$4 sm:$0xff]  }
 0x113   : > { %2255 = vmatprep.subr.bf16.mxu0 %v5067_v33  ;;  %2707 = vmatprep.subr.bf16.mxu1 %v5070_v34  ;;  %v5124_v33 = vld [vmem:[#allocation4 + $0x3ac] ss:$16 sps:$4 sm:$0xff]   ;;  %v569_v34 = vpack.c.bf16 %v505_v31, %v497_v30  ;;  %v442_v30 = vld [vmem:[%s5909_s13 + $0x1d0] sm:$0xff] }
 0x114   : > { %v5175_v31 = vld [vmem:[#allocation4 + $0x4c4] ss:$16 sps:$4 sm:$0xff]  }
 0x115   : > { %2187 = vmatmul.mubr.bf16.gmra.mrb[8].mxu0 %v528_v37  ;;  %2639 = vmatmul.mubr.bf16.gmra.mrb[8].mxu1 %v528_v37  ;;  %v496_v37 = vld [vmem:[%s5909_s13 + $0x380] sm:$0xff] }
 0x116   : > { %2256 = vmatpush1.bf16.msra.mxu0 %v5065_v35  ;;  %2708 = vmatpush1.bf16.msra.mxu1 %v5068_v36  ;;  %v5119_v35 = vld [vmem:[#allocation4 + $0x3a0] ss:$16 sps:$4 sm:$0xff]   ;;  %v5122_v36 = vld [vmem:[#allocation4 + $0x3a8] ss:$16 sps:$4 sm:$0xff]  }
 0x117   : > { %2257 = vmatprep.subr.bf16.mxu0 %v5073_v40  ;;  %2709 = vmatprep.subr.bf16.mxu1 %v5076_v41  ;;  %v5130_v40 = vld [vmem:[#allocation4 + $0x3cc] ss:$16 sps:$4 sm:$0xff]   ;;  %v5125_v41 = vld [vmem:[#allocation4 + $0x3c0] ss:$16 sps:$4 sm:$0xff]  }
 0x118   : > { %2196 = vmatprep.mubr.bf16.mxu0 %v537_v43  ;;  %2648 = vmatprep.mubr.bf16.mxu1 %v537_v43  ;;  %v568_v43 = vpack.c.bf16 %v504_v38, %v496_v37  ;;  %v459_v37 = vld [vmem:[%s5909_s13 + $0x258] sm:$0xff]  ;;  %v5181_v38 = vld [vmem:[#allocation4 + $0x4e4] ss:$16 sps:$4 sm:$0xff]  }
 0x11a   : > { %2258 = vmatpush1.bf16.msra.mxu0 %v5071_v42  ;;  %2710 = vmatpush1.bf16.msra.mxu1 %v5074_v44  ;;  %v5128_v42 = vld [vmem:[#allocation4 + $0x3c8] ss:$16 sps:$4 sm:$0xff]  }
 0x11b   : > { %2259 = vmatprep.subr.bf16.mxu0 %v5079_v47  ;;  %2711 = vmatprep.subr.bf16.mxu1 %v5082_v48  ;;  %v387_v44 = vld [vmem:[%s5909_s13 + $0x18] sm:$0xff]  ;;  %v5131_v48 = vld [vmem:[#allocation4 + $0x3e0] ss:$16 sps:$4 sm:$0xff]  }
 0x11c   : > { %v5136_v47 = vld [vmem:[#allocation4 + $0x3ec] ss:$16 sps:$4 sm:$0xff]  }
 0x11d   : > { %2197 = vmatmul.mubr.bf16.gmra.mrb[12].mxu0 %v536_v50  ;;  %2649 = vmatmul.mubr.bf16.gmra.mrb[12].mxu1 %v536_v50  ;;  %v5134_v50 = vld [vmem:[#allocation4 + $0x3e8] ss:$16 sps:$4 sm:$0xff]  }
 0x11e   : > { %2260 = vmatpush1.bf16.msra.mxu0 %v5077_v49  ;;  %2712 = vmatpush1.bf16.msra.mxu1 %v5080_v53  ;;  %v515_v49 = vpack.c.bf16 %v395_v45, %v387_v44  ;;  %v5139_v53 = vld [vmem:[#allocation4 + $0x404] ss:$16 sps:$4 sm:$0xff]  }
 0x11f   : > { %2261 = vmatprep.subr.bf16.mxu0 %v5085_v54  ;;  %2713 = vmatprep.subr.bf16.mxu1 %v5088_v55  ;;  %v5142_v54 = vld [vmem:[#allocation4 + $0x40c] ss:$16 sps:$4 sm:$0xff]   ;;  %v5137_v55 = vld [vmem:[#allocation4 + $0x400] ss:$16 sps:$4 sm:$0xff]   ;;  %v5187_v45 = vld [vmem:[#allocation4 + $0x504] ss:$16 sps:$4 sm:$0xff]  }
 0x120   : > { %2206 = vmatprep.mubr.bf16.mxu0 %v545_v58  ;;  %2658 = vmatprep.mubr.bf16.mxu1 %v545_v58  ;;  %v411_v58 = vld [vmem:[%s5909_s13 + $0xd8] sm:$0xff]  ;;  %v458_v44 = vld [vmem:[%s5909_s13 + $0x250] sm:$0xff] }
 0x122   : > { %2262 = vmatpush1.bf16.msra.mxu0 %v5083_v56  ;;  %2714 = vmatpush1.bf16.msra.mxu1 %v5086_v57  ;;  %v514_v56 = vpack.c.bf16 %v394_v52, %v386_v51  ;;  %v403_v57 = vld [vmem:[%s5909_s13 + $0x98] sm:$0xff]  ;;  %v5193_v52 = vld [vmem:[#allocation4 + $0x524] ss:$16 sps:$4 sm:$0xff]  }
 0x123   : > { %2263 = vmatprep.subr.bf16.mxu0 %v5091_v61  ;;  %2715 = vmatprep.subr.bf16.mxu1 %v5094_v62  ;;  %v5148_v61 = vld [vmem:[#allocation4 + $0x42c] ss:$16 sps:$4 sm:$0xff]   ;;  %v5143_v62 = vld [vmem:[#allocation4 + $0x420] ss:$16 sps:$4 sm:$0xff]   ;;  %v523_v0 = vpack.c.bf16 %v411_v58, %v403_v57 }
 0x124   : > { %v475_v51 = vld [vmem:[%s5909_s13 + $0x2d8] sm:$0xff]  ;;  %v466_v57 = vld [vmem:[%s5909_s13 + $0x290] sm:$0xff] }
 0x125   : > { %2207 = vmatmul.mubr.bf16.gmra.mrb[16].mxu0 %v544_v63  ;;  %2659 = vmatmul.mubr.bf16.gmra.mrb[16].mxu1 %v544_v63  ;;  %v5146_v63 = vld [vmem:[#allocation4 + $0x428] ss:$16 sps:$4 sm:$0xff]   ;;  %v474_v58 = vld [vmem:[%s5909_s13 + $0x2d0] sm:$0xff] }
 0x126   : > { %2264 = vmatpush1.bf16.msra.mxu0 %v5089_v2  ;;  %2716 = vmatpush1.bf16.msra.mxu1 %v5092_v3  ;;  %v410_v2 = vld [vmem:[%s5909_s13 + $0xd0] sm:$0xff] }
 0x127   : > { %2265 = vmatprep.subr.bf16.mxu0 %v5097_v4  ;;  %2717 = vmatprep.subr.bf16.mxu1 %v5100_v5  ;;  %v5151_v3 = vld [vmem:[#allocation4 + $0x444] ss:$16 sps:$4 sm:$0xff]   ;;  %v5154_v4 = vld [vmem:[#allocation4 + $0x44c] ss:$16 sps:$4 sm:$0xff]   ;;  %v522_v5 = vpack.c.bf16 %v410_v2, %v402_v1  ;;  %v5200_v1 = vld [vmem:[#allocation4 + $0x548] ss:$16 sps:$4 sm:$0xff]  }
 0x128   : > { %2216 = vmatprep.mubr.bf16.mxu0 %v553_v8  ;;  %2668 = vmatprep.mubr.bf16.mxu1 %v553_v8  ;;  %v5149_v8 = vld [vmem:[#allocation4 + $0x440] ss:$16 sps:$4 sm:$0xff]   ;;  %v5205_v2 = vld [vmem:[#allocation4 + $0x564] ss:$16 sps:$4 sm:$0xff]  }
 0x12a   : > { %2266 = vmatpush1.bf16.msra.mxu0 %v5095_v6  ;;  %2718 = vmatpush1.bf16.msra.mxu1 %v5098_v7  ;;  %v419_v6 = vld [vmem:[%s5909_s13 + $0x118] sm:$0xff] }
 0x12b   : > { %2267 = vmatprep.subr.bf16.mxu0 %v5103_v11  ;;  %2719 = vmatprep.subr.bf16.mxu1 %v5106_v12  ;;  %v427_v7 = vld [vmem:[%s5909_s13 + $0x158] sm:$0xff]  ;;  %v5155_v12 = vld [vmem:[#allocation4 + $0x460] ss:$16 sps:$4 sm:$0xff]  }
 0x12c   : > { %v5160_v11 = vld [vmem:[#allocation4 + $0x46c] ss:$16 sps:$4 sm:$0xff]  }
 0x12d   : > { %2217 = vmatmul.mubr.bf16.gmra.mrb[20].mxu0 %v552_v14  ;;  %2669 = vmatmul.mubr.bf16.gmra.mrb[20].mxu1 %v552_v14  ;;  %v531_v14 = vpack.c.bf16 %v427_v7, %v419_v6  ;;  %v482_v7 = vld [vmem:[%s5909_s13 + $0x310] sm:$0xff] }
 0x12e   : > { %2268 = vmatpush1.bf16.msra.mxu0 %v5101_v13  ;;  %2720 = vmatpush1.bf16.msra.mxu1 %v5104_v15  ;;  %v5158_v13 = vld [vmem:[#allocation4 + $0x468] ss:$16 sps:$4 sm:$0xff]   ;;  %v418_v15 = vld [vmem:[%s5909_s13 + $0x110] sm:$0xff] }
 0x12f   : > { %2269 = vmatprep.subr.bf16.mxu0 %v5109_v18  ;;  %2721 = vmatprep.subr.bf16.mxu1 %v5112_v19  ;;  %v5166_v18 = vld [vmem:[#allocation4 + $0x48c] ss:$16 sps:$4 sm:$0xff]   ;;  %v5161_v19 = vld [vmem:[#allocation4 + $0x480] ss:$16 sps:$4 sm:$0xff]  }
 0x130   : > { %2226 = vmatprep.mubr.bf16.mxu0 %v561_v21  ;;  %2678 = vmatprep.mubr.bf16.mxu1 %v561_v21  ;;  %v5164_v21 = vld [vmem:[#allocation4 + $0x488] ss:$16 sps:$4 sm:$0xff]  }
 0x132   : > { %2270 = vmatpush1.bf16.msra.mxu0 %v5107_v20  ;;  %2722 = vmatpush1.bf16.msra.mxu1 %v5110_v22  ;;  %v530_v20 = vpack.c.bf16 %v426_v16, %v418_v15  ;;  %v435_v22 = vld [vmem:[%s5909_s13 + $0x198] sm:$0xff]  ;;  %v5217_v16 = vld [vmem:[#allocation4 + $0x5a4] ss:$16 sps:$4 sm:$0xff]  }
 0x133   : > { %2271 = vmatprep.subr.bf16.mxu0 %v5115_v25  ;;  %2723 = vmatprep.subr.bf16.mxu1 %v5118_v26  ;;  %v5172_v25 = vld [vmem:[#allocation4 + $0x4ac] ss:$16 sps:$4 sm:$0xff]   ;;  %v5167_v26 = vld [vmem:[#allocation4 + $0x4a0] ss:$16 sps:$4 sm:$0xff]   ;;  %v5212_v15 = vld [vmem:[#allocation4 + $0x588] ss:$16 sps:$4 sm:$0xff]  }
 0x135   : > { %2227 = vmatmul.mubr.bf16.gmra.mrb[24].mxu0 %v560_v29  ;;  %2679 = vmatmul.mubr.bf16.gmra.mrb[24].mxu1 %v560_v29  ;;  %v434_v29 = vld [vmem:[%s5909_s13 + $0x190] sm:$0xff] }
 0x136   : > { %2272 = vmatpush1.bf16.msra.mxu0 %v5113_v27  ;;  %2724 = vmatpush1.bf16.msra.mxu1 %v5116_v28  ;;  %v539_v27 = vpack.c.bf16 %v443_v23, %v435_v22  ;;  %v5170_v28 = vld [vmem:[#allocation4 + $0x4a8] ss:$16 sps:$4 sm:$0xff]   ;;  %v506_v22 = vld [vmem:[%s5909_s13 + $0x3d0] sm:$0xff] }
 0x137   : > { %2273 = vmatprep.subr.bf16.mxu0 %v5121_v32  ;;  %2725 = vmatprep.subr.bf16.mxu1 %v5124_v33  ;;  %v5178_v32 = vld [vmem:[#allocation4 + $0x4cc] ss:$16 sps:$4 sm:$0xff]   ;;  %v5173_v33 = vld [vmem:[#allocation4 + $0x4c0] ss:$16 sps:$4 sm:$0xff]   ;;  %v5223_v23 = vld [vmem:[#allocation4 + $0x5c4] ss:$16 sps:$4 sm:$0xff]  }
 0x138   : > { %2236 = vmatprep.mubr.bf16.mxu0 %v569_v34  ;;  %2688 = vmatprep.mubr.bf16.mxu1 %v569_v34  ;;  %v5176_v34 = vld [vmem:[#allocation4 + $0x4c8] ss:$16 sps:$4 sm:$0xff]  }
 0x13a   : > { %2274 = vmatpush1.bf16.msra.mxu0 %v5119_v35  ;;  %2726 = vmatpush1.bf16.msra.mxu1 %v5122_v36  ;;  %v538_v35 = vpack.c.bf16 %v442_v30, %v434_v29  ;;  %v451_v36 = vld [vmem:[%s5909_s13 + $0x218] sm:$0xff]  ;;  %v397_v29 = vld [vmem:[%s5909_s13 + $0x68] sm:$0xff]  ;;  %v5229_v30 = vld [vmem:[#allocation4 + $0x5e4] ss:$16 sps:$4 sm:$0xff]  }
 0x13b   : > { %2275 = vmatprep.subr.bf16.mxu0 %v5127_v39  ;;  %2727 = vmatprep.subr.bf16.mxu1 %v5130_v40  ;;  %v5184_v39 = vld [vmem:[#allocation4 + $0x4ec] ss:$16 sps:$4 sm:$0xff]   ;;  %v547_v40 = vpack.c.bf16 %v459_v37, %v451_v36  ;;  %v396_v36 = vld [vmem:[%s5909_s13 + $0x60] sm:$0xff] }
 0x13c   : > { %v5235_v37 = vld [vmem:[#allocation4 + $0x604] ss:$16 sps:$4 sm:$0xff]  }
 0x13d   : > { %2237 = vmatmul.mubr.bf16.gmra.mrb[28].mxu0 %v568_v43  ;;  %2689 = vmatmul.mubr.bf16.gmra.mrb[28].mxu1 %v568_v43  ;;  %v450_v43 = vld [vmem:[%s5909_s13 + $0x210] sm:$0xff] }
 0x13e   : > { %2276 = vmatpush1.bf16.msra.mxu0 %v5125_v41  ;;  %2728 = vmatpush1.bf16.msra.mxu1 %v5128_v42  ;;  %v5179_v41 = vld [vmem:[#allocation4 + $0x4e0] ss:$16 sps:$4 sm:$0xff]   ;;  %v5182_v42 = vld [vmem:[#allocation4 + $0x4e8] ss:$16 sps:$4 sm:$0xff]  }
 0x13f   : > { %2277 = vmatprep.subr.bf16.mxu0 %v5133_v46  ;;  %2729 = vmatprep.subr.bf16.mxu1 %v5136_v47  ;;  %v5190_v46 = vld [vmem:[#allocation4 + $0x50c] ss:$16 sps:$4 sm:$0xff]   ;;  %v5185_v47 = vld [vmem:[#allocation4 + $0x500] ss:$16 sps:$4 sm:$0xff]  }
 0x140   : > { %2279 = vmatprep.mubr.bf16.mxu0 %v515_v49  ;;  %2731 = vmatprep.mubr.bf16.mxu1 %v515_v49  ;;  %v546_v49 = vpack.c.bf16 %v458_v44, %v450_v43  ;;  %v413_v43 = vld [vmem:[%s5909_s13 + $0xe8] sm:$0xff]  ;;  %v5241_v44 = vld [vmem:[#allocation4 + $0x624] ss:$16 sps:$4 sm:$0xff]  }
 0x142   : > { %2278 = vmatpush1.bf16.msra.mxu0 %v5131_v48  ;;  %2730 = vmatpush1.bf16.msra.mxu1 %v5134_v50  ;;  %v5188_v48 = vld [vmem:[#allocation4 + $0x508] ss:$16 sps:$4 sm:$0xff]  }
 0x143   : > { %2360 = vmatprep.subr.bf16.mxu0 %v5139_v53  ;;  %2812 = vmatprep.subr.bf16.mxu1 %v5142_v54  ;;  %v467_v50 = vld [vmem:[%s5909_s13 + $0x298] sm:$0xff]  ;;  %v5191_v54 = vld [vmem:[#allocation4 + $0x520] ss:$16 sps:$4 sm:$0xff]  }
 0x144   : > { %v5196_v53 = vld [vmem:[#allocation4 + $0x52c] ss:$16 sps:$4 sm:$0xff]  }
 0x145   : > { %2280 = vmatmul.mubr.bf16.vlgmr.msra.gmra.mrb[0].mxu0 %v514_v56  ;;  %2732 = vmatmul.mubr.bf16.vlgmr.msra.gmra.mrb[0].mxu1 %v514_v56  ;;  %v5194_v56 = vld [vmem:[#allocation4 + $0x528] ss:$16 sps:$4 sm:$0xff]  }
 0x146   : > { %2361 = vmatpush1.bf16.msra.mxu0 %v5137_v55  ;;  %2813 = vmatpush1.bf16.msra.mxu1 %v5140_v59  ;;  %v555_v55 = vpack.c.bf16 %v475_v51, %v467_v50  ;;  %v5199_v59 = vld [vmem:[#allocation4 + $0x544] ss:$16 sps:$4 sm:$0xff]  }
 0x147   : > { %2362 = vmatprep.subr.bf16.mxu0 %v5145_v60  ;;  %2814 = vmatprep.subr.bf16.mxu1 %v5148_v61  ;;  %v5202_v60 = vld [vmem:[#allocation4 + $0x54c] ss:$16 sps:$4 sm:$0xff]   ;;  %v5197_v61 = vld [vmem:[#allocation4 + $0x540] ss:$16 sps:$4 sm:$0xff]   ;;  %v5247_v51 = vld [vmem:[#allocation4 + $0x644] ss:$16 sps:$4 sm:$0xff]  }
 0x148   : > { %2289 = vmatprep.mubr.bf16.mxu0 %v523_v0  ;;  %2741 = vmatprep.mubr.bf16.mxu1 %v523_v0  ;;  %v491_v0 = vld [vmem:[%s5909_s13 + $0x358] sm:$0xff]  ;;  %v412_v50 = vld [vmem:[%s5909_s13 + $0xe0] sm:$0xff] }
 0x14a   : > { %2363 = vmatpush1.bf16.msra.mxu0 %v5143_v62  ;;  %2815 = vmatpush1.bf16.msra.mxu1 %v5146_v63  ;;  %v554_v62 = vpack.c.bf16 %v474_v58, %v466_v57  ;;  %v483_v63 = vld [vmem:[%s5909_s13 + $0x318] sm:$0xff]  ;;  %v429_v57 = vld [vmem:[%s5909_s13 + $0x168] sm:$0xff]  ;;  %v5253_v58 = vld [vmem:[#allocation4 + $0x664] ss:$16 sps:$4 sm:$0xff]  }
 0x14b   : > { %2364 = vmatprep.subr.bf16.mxu0 %v5151_v3  ;;  %2816 = vmatprep.subr.bf16.mxu1 %v5154_v4  ;;  %v5208_v3 = vld [vmem:[#allocation4 + $0x56c] ss:$16 sps:$4 sm:$0xff]   ;;  %v5203_v4 = vld [vmem:[#allocation4 + $0x560] ss:$16 sps:$4 sm:$0xff]   ;;  %v563_v6 = vpack.c.bf16 %v491_v0, %v483_v63 }
 0x14c   : > { %v420_v63 = vld [vmem:[%s5909_s13 + $0x120] sm:$0xff] }
 0x14d   : > { %2290 = vmatmul.mubr.bf16.gmra.mrb[4].mxu0 %v522_v5  ;;  %2742 = vmatmul.mubr.bf16.gmra.mrb[4].mxu1 %v522_v5  ;;  %v5206_v5 = vld [vmem:[#allocation4 + $0x568] ss:$16 sps:$4 sm:$0xff]   ;;  %v428_v0 = vld [vmem:[%s5909_s13 + $0x160] sm:$0xff] }
 0x14e   : > { %2365 = vmatpush1.bf16.msra.mxu0 %v5149_v8  ;;  %2817 = vmatpush1.bf16.msra.mxu1 %v5152_v9  ;;  %v490_v8 = vld [vmem:[%s5909_s13 + $0x350] sm:$0xff] }
 0x14f   : > { %2366 = vmatprep.subr.bf16.mxu0 %v5157_v10  ;;  %2818 = vmatprep.subr.bf16.mxu1 %v5160_v11  ;;  %v5211_v9 = vld [vmem:[#allocation4 + $0x584] ss:$16 sps:$4 sm:$0xff]   ;;  %v5214_v10 = vld [vmem:[#allocation4 + $0x58c] ss:$16 sps:$4 sm:$0xff]   ;;  %v562_v11 = vpack.c.bf16 %v490_v8, %v482_v7  ;;  %v5260_v7 = vld [vmem:[#allocation4 + $0x688] ss:$16 sps:$4 sm:$0xff]  }
 0x150   : > { %2299 = vmatprep.mubr.bf16.mxu0 %v531_v14  ;;  %2751 = vmatprep.mubr.bf16.mxu1 %v531_v14  ;;  %v5209_v14 = vld [vmem:[#allocation4 + $0x580] ss:$16 sps:$4 sm:$0xff]   ;;  %v5265_v8 = vld [vmem:[#allocation4 + $0x6a4] ss:$16 sps:$4 sm:$0xff]  }
 0x152   : > { %2367 = vmatpush1.bf16.msra.mxu0 %v5155_v12  ;;  %2819 = vmatpush1.bf16.msra.mxu1 %v5158_v13  ;;  %v499_v12 = vld [vmem:[%s5909_s13 + $0x398] sm:$0xff] }
 0x153   : > { %2368 = vmatprep.subr.bf16.mxu0 %v5163_v17  ;;  %2820 = vmatprep.subr.bf16.mxu1 %v5166_v18  ;;  %v507_v13 = vld [vmem:[%s5909_s13 + $0x3d8] sm:$0xff]  ;;  %v5215_v18 = vld [vmem:[#allocation4 + $0x5a0] ss:$16 sps:$4 sm:$0xff]  }
 0x154   : > { %v5220_v17 = vld [vmem:[#allocation4 + $0x5ac] ss:$16 sps:$4 sm:$0xff]  }
 0x155   : > { %2300 = vmatmul.mubr.bf16.gmra.mrb[8].mxu0 %v530_v20  ;;  %2752 = vmatmul.mubr.bf16.gmra.mrb[8].mxu1 %v530_v20  ;;  %v571_v20 = vpack.c.bf16 %v507_v13, %v499_v12  ;;  %v5266_v12 = vld [vmem:[#allocation4 + $0x6a8] ss:$16 sps:$4 sm:$0xff]   ;;  %v436_v13 = vld [vmem:[%s5909_s13 + $0x1a0] sm:$0xff] }
 0x156   : > { %2369 = vmatpush1.bf16.msra.mxu0 %v5161_v19  ;;  %2821 = vmatpush1.bf16.msra.mxu1 %v5164_v21  ;;  %v5218_v19 = vld [vmem:[#allocation4 + $0x5a8] ss:$16 sps:$4 sm:$0xff]   ;;  %v498_v21 = vld [vmem:[%s5909_s13 + $0x390] sm:$0xff] }
 0x157   : > { %2370 = vmatprep.subr.bf16.mxu0 %v5169_v24  ;;  %2822 = vmatprep.subr.bf16.mxu1 %v5172_v25  ;;  %v5226_v24 = vld [vmem:[#allocation4 + $0x5cc] ss:$16 sps:$4 sm:$0xff]   ;;  %v5221_v25 = vld [vmem:[#allocation4 + $0x5c0] ss:$16 sps:$4 sm:$0xff]  }
 0x158   : > { %2309 = vmatprep.mubr.bf16.mxu0 %v539_v27  ;;  %2761 = vmatprep.mubr.bf16.mxu1 %v539_v27  ;;  %v5224_v27 = vld [vmem:[#allocation4 + $0x5c8] ss:$16 sps:$4 sm:$0xff]  }
 0x15a   : > { %2371 = vmatpush1.bf16.msra.mxu0 %v5167_v26  ;;  %2823 = vmatpush1.bf16.msra.mxu1 %v5170_v28  ;;  %v570_v26 = vpack.c.bf16 %v506_v22, %v498_v21  ;;  %v389_v28 = vld [vmem:[%s5909_s13 + $0x28] sm:$0xff]  ;;  %v5277_v22 = vld [vmem:[#allocation4 + $0x6e4] ss:$16 sps:$4 sm:$0xff]  }
 0x15b   : > { %2372 = vmatprep.subr.bf16.mxu0 %v5175_v31  ;;  %2824 = vmatprep.subr.bf16.mxu1 %v5178_v32  ;;  %v5232_v31 = vld [vmem:[#allocation4 + $0x5ec] ss:$16 sps:$4 sm:$0xff]   ;;  %v5227_v32 = vld [vmem:[#allocation4 + $0x5e0] ss:$16 sps:$4 sm:$0xff]  }
 0x15c   : > { %v461_v21 = vld [vmem:[%s5909_s13 + $0x268] sm:$0xff] }
 0x15d   : > { %2310 = vmatmul.mubr.bf16.gmra.mrb[12].mxu0 %v538_v35  ;;  %2762 = vmatmul.mubr.bf16.gmra.mrb[12].mxu1 %v538_v35  ;;  %v388_v35 = vld [vmem:[%s5909_s13 + $0x20] sm:$0xff] }
 0x15e   : > { %2373 = vmatpush1.bf16.msra.mxu0 %v5173_v33  ;;  %2825 = vmatpush1.bf16.msra.mxu1 %v5176_v34  ;;  %v517_v33 = vpack.c.bf16 %v397_v29, %v389_v28  ;;  %v5230_v34 = vld [vmem:[#allocation4 + $0x5e8] ss:$16 sps:$4 sm:$0xff]   ;;  %v460_v28 = vld [vmem:[%s5909_s13 + $0x260] sm:$0xff] }
 0x15f   : > { %2374 = vmatprep.subr.bf16.mxu0 %v5181_v38  ;;  %2826 = vmatprep.subr.bf16.mxu1 %v5184_v39  ;;  %v5238_v38 = vld [vmem:[#allocation4 + $0x60c] ss:$16 sps:$4 sm:$0xff]   ;;  %v5233_v39 = vld [vmem:[#allocation4 + $0x600] ss:$16 sps:$4 sm:$0xff]   ;;  %v5283_v29 = vld [vmem:[#allocation4 + $0x704] ss:$16 sps:$4 sm:$0xff]  }
 0x160   : > { %2319 = vmatprep.mubr.bf16.mxu0 %v547_v40  ;;  %2771 = vmatprep.mubr.bf16.mxu1 %v547_v40  ;;  %v5236_v40 = vld [vmem:[#allocation4 + $0x608] ss:$16 sps:$4 sm:$0xff]  }
 0x162   : > { %2375 = vmatpush1.bf16.msra.mxu0 %v5179_v41  ;;  %2827 = vmatpush1.bf16.msra.mxu1 %v5182_v42  ;;  %v516_v41 = vpack.c.bf16 %v396_v36, %v388_v35  ;;  %v405_v42 = vld [vmem:[%s5909_s13 + $0xa8] sm:$0xff]  ;;  %v5289_v36 = vld [vmem:[#allocation4 + $0x724] ss:$16 sps:$4 sm:$0xff]  }
 0x163   : > { %2376 = vmatprep.subr.bf16.mxu0 %v5187_v45  ;;  %2828 = vmatprep.subr.bf16.mxu1 %v5190_v46  ;;  %v5244_v45 = vld [vmem:[#allocation4 + $0x62c] ss:$16 sps:$4 sm:$0xff]   ;;  %v525_v46 = vpack.c.bf16 %v413_v43, %v405_v42  ;;  %v476_v42 = vld [vmem:[%s5909_s13 + $0x2e0] sm:$0xff] }
 0x164   : > { %v477_v35 = vld [vmem:[%s5909_s13 + $0x2e8] sm:$0xff]  ;;  %v5295_v43 = vld [vmem:[#allocation4 + $0x744] ss:$16 sps:$4 sm:$0xff]  }
 0x165   : > { %2320 = vmatmul.mubr.bf16.gmra.mrb[16].mxu0 %v546_v49  ;;  %2772 = vmatmul.mubr.bf16.gmra.mrb[16].mxu1 %v546_v49  ;;  %v404_v49 = vld [vmem:[%s5909_s13 + $0xa0] sm:$0xff] }
 0x166   : > { %2377 = vmatpush1.bf16.msra.mxu0 %v5185_v47  ;;  %2829 = vmatpush1.bf16.msra.mxu1 %v5188_v48  ;;  %v5239_v47 = vld [vmem:[#allocation4 + $0x620] ss:$16 sps:$4 sm:$0xff]   ;;  %v5242_v48 = vld [vmem:[#allocation4 + $0x628] ss:$16 sps:$4 sm:$0xff]  }
 0x167   : > { %2378 = vmatprep.subr.bf16.mxu0 %v5193_v52  ;;  %2830 = vmatprep.subr.bf16.mxu1 %v5196_v53  ;;  %v5250_v52 = vld [vmem:[#allocation4 + $0x64c] ss:$16 sps:$4 sm:$0xff]   ;;  %v5245_v53 = vld [vmem:[#allocation4 + $0x640] ss:$16 sps:$4 sm:$0xff]  }
 0x168   : > { %2329 = vmatprep.mubr.bf16.mxu0 %v555_v55  ;;  %2781 = vmatprep.mubr.bf16.mxu1 %v555_v55  ;;  %v524_v55 = vpack.c.bf16 %v412_v50, %v404_v49  ;;  %v493_v49 = vld [vmem:[%s5909_s13 + $0x368] sm:$0xff]  ;;  %v5301_v50 = vld [vmem:[#allocation4 + $0x764] ss:$16 sps:$4 sm:$0xff]  }
 0x16a   : > { %2379 = vmatpush1.bf16.msra.mxu0 %v5191_v54  ;;  %2831 = vmatpush1.bf16.msra.mxu1 %v5194_v56  ;;  %v5248_v54 = vld [vmem:[#allocation4 + $0x648] ss:$16 sps:$4 sm:$0xff]  }
 0x16b   : > { %2380 = vmatprep.subr.bf16.mxu0 %v5199_v59  ;;  %2832 = vmatprep.subr.bf16.mxu1 %v5202_v60  ;;  %v421_v56 = vld [vmem:[%s5909_s13 + $0x128] sm:$0xff] }
 0x16c   : > { %v5256_v59 = vld [vmem:[#allocation4 + $0x66c] ss:$16 sps:$4 sm:$0xff]   ;;  %v533_v60 = vpack.c.bf16 %v429_v57, %v421_v56  ;;  %v492_v56 = vld [vmem:[%s5909_s13 + $0x360] sm:$0xff] }
 0x16d   : > { %2330 = vmatmul.mubr.bf16.gmra.mrb[20].mxu0 %v554_v62  ;;  %2782 = vmatmul.mubr.bf16.gmra.mrb[20].mxu1 %v554_v62  ;;  %v5254_v62 = vld [vmem:[#allocation4 + $0x668] ss:$16 sps:$4 sm:$0xff]   ;;  %v5307_v57 = vld [vmem:[#allocation4 + $0x784] ss:$16 sps:$4 sm:$0xff]  }
 0x16e   : > { %2381 = vmatpush1.bf16.msra.mxu0 %v5197_v61  ;;  %2833 = vmatpush1.bf16.msra.mxu1 %v5200_v1  ;;  %v5251_v61 = vld [vmem:[#allocation4 + $0x660] ss:$16 sps:$4 sm:$0xff]   ;;  %v5259_v1 = vld [vmem:[#allocation4 + $0x684] ss:$16 sps:$4 sm:$0xff]  }
 0x16f   : > { %2382 = vmatprep.subr.bf16.mxu0 %v5205_v2  ;;  %2834 = vmatprep.subr.bf16.mxu1 %v5208_v3  ;;  %v5262_v2 = vld [vmem:[#allocation4 + $0x68c] ss:$16 sps:$4 sm:$0xff]   ;;  %v532_v3 = vpack.c.bf16 %v428_v0, %v420_v63  ;;  %v5308_v63 = vld [vmem:[#allocation4 + $0x788] ss:$16 sps:$4 sm:$0xff]   ;;  %v5313_v0 = vld [vmem:[#allocation4 + $0x7a4] ss:$16 sps:$4 sm:$0xff]  }
 0x170   : > { %2339 = vmatprep.mubr.bf16.mxu0 %v563_v6  ;;  %2791 = vmatprep.mubr.bf16.mxu1 %v563_v6  ;;  %v5257_v6 = vld [vmem:[#allocation4 + $0x680] ss:$16 sps:$4 sm:$0xff]  }
 0x172   : > { %2383 = vmatpush1.bf16.msra.mxu0 %v5203_v4  ;;  %2835 = vmatpush1.bf16.msra.mxu1 %v5206_v5  ;;  %v437_v4 = vld [vmem:[%s5909_s13 + $0x1a8] sm:$0xff] }
 0x173   : > { %2384 = vmatprep.subr.bf16.mxu0 %v5211_v9  ;;  %2836 = vmatprep.subr.bf16.mxu1 %v5214_v10  ;;  %v445_v5 = vld [vmem:[%s5909_s13 + $0x1e8] sm:$0xff] }
 0x174   : > { %v5268_v9 = vld [vmem:[#allocation4 + $0x6ac] ss:$16 sps:$4 sm:$0xff]   ;;  %v541_v10 = vpack.c.bf16 %v445_v5, %v437_v4  ;;  %v500_v5 = vld [vmem:[%s5909_s13 + $0x3a0] sm:$0xff] }
 0x175   : > { %2340 = vmatmul.mubr.bf16.gmra.mrb[24].mxu0 %v562_v11  ;;  %2792 = vmatmul.mubr.bf16.gmra.mrb[24].mxu1 %v562_v11  ;;  %v5263_v11 = vld [vmem:[#allocation4 + $0x6a0] ss:$16 sps:$4 sm:$0xff]  }
 0x176   : > { %2385 = vmatpush1.bf16.msra.mxu0 %v5209_v14  ;;  %2837 = vmatpush1.bf16.msra.mxu1 %v5212_v15  ;;  %v444_v14 = vld [vmem:[%s5909_s13 + $0x1e0] sm:$0xff] }
 0x177   : > { %2386 = vmatprep.subr.bf16.mxu0 %v5217_v16  ;;  %2838 = vmatprep.subr.bf16.mxu1 %v5220_v17  ;;  %v5271_v15 = vld [vmem:[#allocation4 + $0x6c4] ss:$16 sps:$4 sm:$0xff]   ;;  %v5274_v16 = vld [vmem:[#allocation4 + $0x6cc] ss:$16 sps:$4 sm:$0xff]   ;;  %v5269_v17 = vld [vmem:[#allocation4 + $0x6c0] ss:$16 sps:$4 sm:$0xff]  }
 0x178   : > { %2349 = vmatprep.mubr.bf16.mxu0 %v571_v20  ;;  %2801 = vmatprep.mubr.bf16.mxu1 %v571_v20  ;;  %v540_v20 = vpack.c.bf16 %v444_v14, %v436_v13  ;;  %v5325_v14 = vld [vmem:[#allocation4 + $0x7e4] ss:$16 sps:$4 sm:$0xff]  }
 0x17a   : > { %2387 = vmatpush1.bf16.msra.mxu0 %v5215_v18  ;;  %2839 = vmatpush1.bf16.msra.mxu1 %v5218_v19  ;;  %v5272_v18 = vld [vmem:[#allocation4 + $0x6c8] ss:$16 sps:$4 sm:$0xff]  }
 0x17b   : > { %2388 = vmatprep.subr.bf16.mxu0 %v5223_v23  ;;  %2840 = vmatprep.subr.bf16.mxu1 %v5226_v24  ;;  %v453_v19 = vld [vmem:[%s5909_s13 + $0x228] sm:$0xff]  ;;  %v5275_v24 = vld [vmem:[#allocation4 + $0x6e0] ss:$16 sps:$4 sm:$0xff]  }
 0x17c   : > { %v5280_v23 = vld [vmem:[#allocation4 + $0x6ec] ss:$16 sps:$4 sm:$0xff]  }
 0x17d   : > { %2350 = vmatmul.mubr.bf16.gmra.mrb[28].mxu0 %v570_v26  ;;  %2802 = vmatmul.mubr.bf16.gmra.mrb[28].mxu1 %v570_v26  ;;  %v549_v26 = vpack.c.bf16 %v461_v21, %v453_v19  ;;  %v390_v19 = vld [vmem:[%s5909_s13 + $0x30] sm:$0xff]  ;;  %v407_v21 = vld [vmem:[%s5909_s13 + $0xb8] sm:$0xff] }
 0x17e   : > { %2389 = vmatpush1.bf16.msra.mxu0 %v5221_v25  ;;  %2841 = vmatpush1.bf16.msra.mxu1 %v5224_v27  ;;  %v5278_v25 = vld [vmem:[#allocation4 + $0x6e8] ss:$16 sps:$4 sm:$0xff]   ;;  %v452_v27 = vld [vmem:[%s5909_s13 + $0x220] sm:$0xff] }
 0x17f   : > { %2390 = vmatprep.subr.bf16.mxu0 %v5229_v30  ;;  %2842 = vmatprep.subr.bf16.mxu1 %v5232_v31  ;;  %v5286_v30 = vld [vmem:[#allocation4 + $0x70c] ss:$16 sps:$4 sm:$0xff]   ;;  %v5281_v31 = vld [vmem:[#allocation4 + $0x700] ss:$16 sps:$4 sm:$0xff]  }
 0x180   : > { %2392 = vmatprep.mubr.bf16.mxu0 %v517_v33  ;;  %2844 = vmatprep.mubr.bf16.mxu1 %v517_v33  ;;  %v469_v33 = vld [vmem:[%s5909_s13 + $0x2a8] sm:$0xff] }
 0x182   : > { %2391 = vmatpush1.bf16.msra.mxu0 %v5227_v32  ;;  %2843 = vmatpush1.bf16.msra.mxu1 %v5230_v34  ;;  %v5284_v32 = vld [vmem:[#allocation4 + $0x708] ss:$16 sps:$4 sm:$0xff]   ;;  %v548_v34 = vpack.c.bf16 %v460_v28, %v452_v27 }
 0x183   : > { %2473 = vmatprep.subr.bf16.mxu0 %v5235_v37  ;;  %2925 = vmatprep.subr.bf16.mxu1 %v5238_v38  ;;  %v5292_v37 = vld [vmem:[#allocation4 + $0x72c] ss:$16 sps:$4 sm:$0xff]   ;;  %v5287_v38 = vld [vmem:[#allocation4 + $0x720] ss:$16 sps:$4 sm:$0xff]   ;;  %v5330_v27 = vld [vmem:[#allocation7] sm:$0xff]  }
 0x184   : > { %v5332_v28 = vld [vmem:[#allocation7 + $0x80] sm:$0xff]  }
 0x185   : > { %2393 = vmatmul.mubr.bf16.vlgmr.msra.gmra.mrb[0].mxu0 %v516_v41  ;;  %2845 = vmatmul.mubr.bf16.vlgmr.msra.gmra.mrb[0].mxu1 %v516_v41  ;;  %v468_v41 = vld [vmem:[%s5909_s13 + $0x2a0] sm:$0xff] }
 0x186   : > { %2474 = vmatpush1.bf16.msra.mxu0 %v5233_v39  ;;  %2926 = vmatpush1.bf16.msra.mxu1 %v5236_v40  ;;  %v5290_v39 = vld [vmem:[#allocation4 + $0x728] ss:$16 sps:$4 sm:$0xff]   ;;  %v557_v40 = vpack.c.bf16 %v477_v35, %v469_v33  ;;  %v5334_v35 = vld [vmem:[#allocation7 + $0x8] sm:$0xff]  }
 0x187   : > { %2475 = vmatprep.subr.bf16.mxu0 %v5241_v44  ;;  %2927 = vmatprep.subr.bf16.mxu1 %v5244_v45  ;;  %v5298_v44 = vld [vmem:[#allocation4 + $0x74c] ss:$16 sps:$4 sm:$0xff]   ;;  %v5293_v45 = vld [vmem:[#allocation4 + $0x740] ss:$16 sps:$4 sm:$0xff]  }
 0x188   : > { %2402 = vmatprep.mubr.bf16.mxu0 %v525_v46  ;;  %2854 = vmatprep.mubr.bf16.mxu1 %v525_v46  ;;  %v5296_v46 = vld [vmem:[#allocation4 + $0x748] ss:$16 sps:$4 sm:$0xff]  }
 0x189   : > { %v423_v33 = vld [vmem:[%s5909_s13 + $0x138] sm:$0xff] }
 0x18a   : > { %2476 = vmatpush1.bf16.msra.mxu0 %v5239_v47  ;;  %2928 = vmatpush1.bf16.msra.mxu1 %v5242_v48  ;;  %v485_v47 = vld [vmem:[%s5909_s13 + $0x328] sm:$0xff]  ;;  %v556_v48 = vpack.c.bf16 %v476_v42, %v468_v41  ;;  %v5338_v41 = vld [vmem:[#allocation7 + $0x10] sm:$0xff]  }
 0x18b   : > { %2477 = vmatprep.subr.bf16.mxu0 %v5247_v51  ;;  %2929 = vmatprep.subr.bf16.mxu1 %v5250_v52  ;;  %v5304_v51 = vld [vmem:[#allocation4 + $0x76c] ss:$16 sps:$4 sm:$0xff]   ;;  %v5299_v52 = vld [vmem:[#allocation4 + $0x760] ss:$16 sps:$4 sm:$0xff]   ;;  %v5340_v42 = vld [vmem:[#allocation7 + $0x90] sm:$0xff]  }
 0x18d   : > { %2403 = vmatmul.mubr.bf16.gmra.mrb[4].mxu0 %v524_v55  ;;  %2855 = vmatmul.mubr.bf16.gmra.mrb[4].mxu1 %v524_v55  ;;  %v484_v55 = vld [vmem:[%s5909_s13 + $0x320] sm:$0xff] }
 0x18e   : > { %2478 = vmatpush1.bf16.msra.mxu0 %v5245_v53  ;;  %2930 = vmatpush1.bf16.msra.mxu1 %v5248_v54  ;;  %v5302_v53 = vld [vmem:[#allocation4 + $0x768] ss:$16 sps:$4 sm:$0xff]   ;;  %v565_v54 = vpack.c.bf16 %v493_v49, %v485_v47  ;;  %v5342_v49 = vld [vmem:[#allocation7 + $0x18] sm:$0xff]  }
 0x18f   : > { %2479 = vmatprep.subr.bf16.mxu0 %v5253_v58  ;;  %2931 = vmatprep.subr.bf16.mxu1 %v5256_v59  ;;  %v5310_v58 = vld [vmem:[#allocation4 + $0x78c] ss:$16 sps:$4 sm:$0xff]   ;;  %v5305_v59 = vld [vmem:[#allocation4 + $0x780] ss:$16 sps:$4 sm:$0xff]  }
 0x190   : > { %2412 = vmatprep.mubr.bf16.mxu0 %v533_v60  ;;  %2864 = vmatprep.mubr.bf16.mxu1 %v533_v60  ;;  %v501_v60 = vld [vmem:[%s5909_s13 + $0x3a8] sm:$0xff]  ;;  %v439_v47 = vld [vmem:[%s5909_s13 + $0x1b8] sm:$0xff] }
 0x192   : > { %2480 = vmatpush1.bf16.msra.mxu0 %v5251_v61  ;;  %2932 = vmatpush1.bf16.msra.mxu1 %v5254_v62  ;;  %v564_v61 = vpack.c.bf16 %v492_v56, %v484_v55  ;;  %v509_v62 = vld [vmem:[%s5909_s13 + $0x3e8] sm:$0xff] }
 0x193   : > { %2481 = vmatprep.subr.bf16.mxu0 %v5259_v1  ;;  %2933 = vmatprep.subr.bf16.mxu1 %v5262_v2  ;;  %v5316_v1 = vld [vmem:[#allocation4 + $0x7ac] ss:$16 sps:$4 sm:$0xff]   ;;  %v5311_v2 = vld [vmem:[#allocation4 + $0x7a0] ss:$16 sps:$4 sm:$0xff]   ;;  %v573_v4 = vpack.c.bf16 %v509_v62, %v501_v60  ;;  %v5346_v55 = vld [vmem:[#allocation7 + $0x20] sm:$0xff]  }
 0x194   : > { %v5348_v56 = vld [vmem:[#allocation7 + $0xa0] sm:$0xff]   ;;  %v446_v60 = vld [vmem:[%s5909_s13 + $0x1f0] sm:$0xff]  ;;  %v463_v62 = vld [vmem:[%s5909_s13 + $0x278] sm:$0xff] }
 0x195   : > { %2413 = vmatmul.mubr.bf16.gmra.mrb[8].mxu0 %v532_v3  ;;  %2865 = vmatmul.mubr.bf16.gmra.mrb[8].mxu1 %v532_v3  ;;  %v5314_v3 = vld [vmem:[#allocation4 + $0x7a8] ss:$16 sps:$4 sm:$0xff]  }
 0x196   : > { %2482 = vmatpush1.bf16.msra.mxu0 %v5257_v6  ;;  %2934 = vmatpush1.bf16.msra.mxu1 %v5260_v7  ;;  %v508_v6 = vld [vmem:[%s5909_s13 + $0x3e0] sm:$0xff] }
 0x197   : > { %2483 = vmatprep.subr.bf16.mxu0 %v5265_v8  ;;  %2935 = vmatprep.subr.bf16.mxu1 %v5268_v9  ;;  %v5319_v7 = vld [vmem:[#allocation4 + $0x7c4] ss:$16 sps:$4 sm:$0xff]   ;;  %v5322_v8 = vld [vmem:[#allocation4 + $0x7cc] ss:$16 sps:$4 sm:$0xff]   ;;  %v572_v13 = vpack.c.bf16 %v508_v6, %v500_v5 }
 0x198   : > { %2422 = vmatprep.mubr.bf16.mxu0 %v541_v10  ;;  %2874 = vmatprep.mubr.bf16.mxu1 %v541_v10  ;;  %v391_v9 = vld [vmem:[%s5909_s13 + $0x38] sm:$0xff] }
 0x199   : > { %v399_v10 = vld [vmem:[%s5909_s13 + $0x78] sm:$0xff] }
 0x19a   : > { %2484 = vmatpush1.bf16.msra.mxu0 %v5263_v11  ;;  %2936 = vmatpush1.bf16.msra.mxu1 %v5266_v12  ;;  %v5317_v11 = vld [vmem:[#allocation4 + $0x7c0] ss:$16 sps:$4 sm:$0xff]   ;;  %v5320_v12 = vld [vmem:[#allocation4 + $0x7c8] ss:$16 sps:$4 sm:$0xff]  }
 0x19b   : > { %2485 = vmatprep.subr.bf16.mxu0 %v5271_v15  ;;  %2937 = vmatprep.subr.bf16.mxu1 %v5274_v16  ;;  %v5328_v15 = vld [vmem:[#allocation4 + $0x7ec] ss:$16 sps:$4 sm:$0xff]   ;;  %v519_v16 = vpack.c.bf16 %v399_v10, %v391_v9  ;;  %v5354_v5 = vld [vmem:[#allocation7 + $0x30] sm:$0xff]  }
 0x19c   : > { %v5356_v6 = vld [vmem:[#allocation7 + $0xb0] sm:$0xff]  }
 0x19d   : > { %2423 = vmatmul.mubr.bf16.gmra.mrb[12].mxu0 %v540_v20  ;;  %2875 = vmatmul.mubr.bf16.gmra.mrb[12].mxu1 %v540_v20  ;;  %v398_v20 = vld [vmem:[%s5909_s13 + $0x70] sm:$0xff]  ;;  %v471_v9 = vld [vmem:[%s5909_s13 + $0x2b8] sm:$0xff] }
 0x19e   : > { %2486 = vmatpush1.bf16.msra.mxu0 %v5269_v17  ;;  %2938 = vmatpush1.bf16.msra.mxu1 %v5272_v18  ;;  %v5323_v17 = vld [vmem:[#allocation4 + $0x7e0] ss:$16 sps:$4 sm:$0xff]   ;;  %v5326_v18 = vld [vmem:[#allocation4 + $0x7e8] ss:$16 sps:$4 sm:$0xff]  }
 0x19f   : > { %2487 = vmatprep.subr.bf16.mxu0 %v5277_v22  ;;  %2939 = vmatprep.subr.bf16.mxu1 %v5280_v23  ;;  %v415_v22 = vld [vmem:[%s5909_s13 + $0xf8] sm:$0xff]  ;;  %v5329_v23 = vld [vmem:[#allocation7 + $0x40] sm:$0xff]  }
 0x1a0   : > { %2432 = vmatprep.mubr.bf16.mxu0 %v549_v26  ;;  %2884 = vmatprep.mubr.bf16.mxu1 %v549_v26  ;;  %v527_v26 = vpack.c.bf16 %v415_v22, %v407_v21  ;;  %v479_v10 = vld [vmem:[%s5909_s13 + $0x2f8] sm:$0xff] }
 0x1a1   : > { %v503_v21 = vld [vmem:[%s5909_s13 + $0x3b8] sm:$0xff] }
 0x1a2   : > { %2488 = vmatpush1.bf16.msra.mxu0 %v5275_v24  ;;  %2940 = vmatpush1.bf16.msra.mxu1 %v5278_v25  ;;  %v5331_v24 = vld [vmem:[#allocation7 + $0xc0] sm:$0xff]   ;;  %v518_v25 = vpack.c.bf16 %v398_v20, %v390_v19  ;;  %v486_v19 = vld [vmem:[%s5909_s13 + $0x330] sm:$0xff]  ;;  %v511_v22 = vld [vmem:[%s5909_s13 + $0x3f8] sm:$0xff] }
 0x1a3   : > { %2489 = vmatprep.subr.bf16.mxu0 %v5283_v29  ;;  %2941 = vmatprep.subr.bf16.mxu1 %v5286_v30  ;;  %v5333_v29 = vld [vmem:[#allocation7 + $0x48] sm:$0xff]  }
 0x1a4   : > { %v5335_v30 = vld [vmem:[#allocation7 + $0xc8] sm:$0xff]  }
 0x1a5   : > { %2433 = vmatmul.mubr.bf16.gmra.mrb[16].mxu0 %v548_v34  ;;  %2885 = vmatmul.mubr.bf16.gmra.mrb[16].mxu1 %v548_v34  ;;  %v431_v34 = vld [vmem:[%s5909_s13 + $0x178] sm:$0xff]  ;;  %v494_v20 = vld [vmem:[%s5909_s13 + $0x370] sm:$0xff] }
 0x1a6   : > { %2490 = vmatpush1.bf16.msra.mxu0 %v5281_v31  ;;  %2942 = vmatpush1.bf16.msra.mxu1 %v5284_v32  ;;  %v406_v31 = vld [vmem:[%s5909_s13 + $0xb0] sm:$0xff] }
 0x1a7   : > { %2491 = vmatprep.subr.bf16.mxu0 %v5289_v36  ;;  %2943 = vmatprep.subr.bf16.mxu1 %v5292_v37  ;;  %v414_v32 = vld [vmem:[%s5909_s13 + $0xf0] sm:$0xff] }
 0x1a8   : > { %2442 = vmatprep.mubr.bf16.mxu0 %v557_v40  ;;  %2894 = vmatprep.mubr.bf16.mxu1 %v557_v40  ;;  %v5336_v36 = vld [vmem:[#allocation7 + $0x88] sm:$0xff]   ;;  %v5337_v37 = vld [vmem:[#allocation7 + $0x50] sm:$0xff]   ;;  %v535_v40 = vpack.c.bf16 %v431_v34, %v423_v33  ;;  %v834_v33 = vlaneseq }
 0x1aa   : > { %2492 = vmatpush1.bf16.msra.mxu0 %v5287_v38  ;;  %2944 = vmatpush1.bf16.msra.mxu1 %v5290_v39  ;;  %v5339_v38 = vld [vmem:[#allocation7 + $0xd0] sm:$0xff]   ;;  %v526_v39 = vpack.c.bf16 %v414_v32, %v406_v31  ;;  %v5360_v31 = vld [vmem:[#allocation7 + $0xb8] sm:$0xff]   ;;  %v6055_v32 = vld [vmem:[#allocation10] sm:$0xff]   ;;  %v835_v34 = vshrl.u32 %v834_v33, 7 }
 0x1ab   : > { %2493 = vmatprep.subr.bf16.mxu0 %v5295_v43  ;;  %2945 = vmatprep.subr.bf16.mxu1 %v5298_v44  ;;  %v5341_v43 = vld [vmem:[#allocation7 + $0x58] sm:$0xff]  }
 0x1ac   : > { %v5343_v44 = vld [vmem:[#allocation7 + $0xd8] sm:$0xff]  }
 0x1ad   : > { %2443 = vmatmul.mubr.bf16.gmra.mrb[20].mxu0 %v556_v48  ;;  %2895 = vmatmul.mubr.bf16.gmra.mrb[20].mxu1 %v556_v48  ;;  %v447_v48 = vld [vmem:[%s5909_s13 + $0x1f8] sm:$0xff] }
 0x1ae   : > { %2494 = vmatpush1.bf16.msra.mxu0 %v5293_v45  ;;  %2946 = vmatpush1.bf16.msra.mxu1 %v5296_v46  ;;  %v422_v45 = vld [vmem:[%s5909_s13 + $0x130] sm:$0xff] }
 0x1af   : > { %2495 = vmatprep.subr.bf16.mxu0 %v5301_v50  ;;  %2947 = vmatprep.subr.bf16.mxu1 %v5304_v51  ;;  %v430_v46 = vld [vmem:[%s5909_s13 + $0x170] sm:$0xff]  ;;  %v5344_v50 = vld [vmem:[#allocation7 + $0x98] sm:$0xff]   ;;  %v5345_v51 = vld [vmem:[#allocation7 + $0x60] sm:$0xff]  }
 0x1b0   : > { %2452 = vmatprep.mubr.bf16.mxu0 %v565_v54  ;;  %2904 = vmatprep.mubr.bf16.mxu1 %v565_v54  ;;  %v543_v54 = vpack.c.bf16 %v447_v48, %v439_v47 }
 0x1b2   : > { %2496 = vmatpush1.bf16.msra.mxu0 %v5299_v52  ;;  %2948 = vmatpush1.bf16.msra.mxu1 %v5302_v53  ;;  %v5347_v52 = vld [vmem:[#allocation7 + $0xe0] sm:$0xff]   ;;  %v534_v53 = vpack.c.bf16 %v430_v46, %v422_v45 }
 0x1b3   : > { %2497 = vmatprep.subr.bf16.mxu0 %v5307_v57  ;;  %2949 = vmatprep.subr.bf16.mxu1 %v5310_v58  ;;  %v5349_v57 = vld [vmem:[#allocation7 + $0x68] sm:$0xff]  }
 0x1b4   : > { %v5351_v58 = vld [vmem:[#allocation7 + $0xe8] sm:$0xff]  }
 0x1b5   : > { %2453 = vmatmul.mubr.bf16.gmra.mrb[24].mxu0 %v564_v61  ;;  %2905 = vmatmul.mubr.bf16.gmra.mrb[24].mxu1 %v564_v61  ;;  %v455_v61 = vld [vmem:[%s5909_s13 + $0x238] sm:$0xff] }
 0x1b6   : > { %2498 = vmatpush1.bf16.msra.mxu0 %v5305_v59  ;;  %2950 = vmatpush1.bf16.msra.mxu1 %v5308_v63  ;;  %v438_v59 = vld [vmem:[%s5909_s13 + $0x1b0] sm:$0xff] }
 0x1b7   : > { %2499 = vmatprep.subr.bf16.mxu0 %v5313_v0  ;;  %2951 = vmatprep.subr.bf16.mxu1 %v5316_v1  ;;  %v5350_v63 = vld [vmem:[#allocation7 + $0x28] sm:$0xff]   ;;  %v5353_v1 = vld [vmem:[#allocation7 + $0x70] sm:$0xff]  }
 0x1b8   : > { %2462 = vmatprep.mubr.bf16.mxu0 %v573_v4  ;;  %2914 = vmatprep.mubr.bf16.mxu1 %v573_v4  ;;  %v5352_v0 = vld [vmem:[#allocation7 + $0xa8] sm:$0xff]   ;;  %v551_v4 = vpack.c.bf16 %v463_v62, %v455_v61 }
 0x1ba   : > { %2500 = vmatpush1.bf16.msra.mxu0 %v5311_v2  ;;  %2952 = vmatpush1.bf16.msra.mxu1 %v5314_v3  ;;  %v5355_v2 = vld [vmem:[#allocation7 + $0xf0] sm:$0xff]   ;;  %v542_v3 = vpack.c.bf16 %v446_v60, %v438_v59 }
 0x1bb   : > { %2501 = vmatprep.subr.bf16.mxu0 %v5319_v7  ;;  %2953 = vmatprep.subr.bf16.mxu1 %v5322_v8  ;;  %v454_v7 = vld [vmem:[%s5909_s13 + $0x230] sm:$0xff] }
 0x1bc   : > { %v462_v8 = vld [vmem:[%s5909_s13 + $0x270] sm:$0xff] }
 0x1bd   : > { %2463 = vmatmul.mubr.bf16.gmra.mrb[28].mxu0 %v572_v13  ;;  %2915 = vmatmul.mubr.bf16.gmra.mrb[28].mxu1 %v572_v13  ;;  %v470_v13 = vld [vmem:[%s5909_s13 + $0x2b0] sm:$0xff] }
 0x1be   : > { %2502 = vmatpush1.bf16.msra.mxu0 %v5317_v11  ;;  %2954 = vmatpush1.bf16.msra.mxu1 %v5320_v12  ;;  %v550_v11 = vpack.c.bf16 %v462_v8, %v454_v7  ;;  %v559_v12 = vpack.c.bf16 %v479_v10, %v471_v9 }
 0x1bf   : > { %2503 = vmatprep.subr.bf16.mxu0 %v5325_v14  ;;  %2955 = vmatprep.subr.bf16.mxu1 %v5328_v15  ;;  %v478_v14 = vld [vmem:[%s5909_s13 + $0x2f0] sm:$0xff]  ;;  %v487_v15 = vld [vmem:[%s5909_s13 + $0x338] sm:$0xff] }
 0x1c0   : > { %2505 = vmatprep.mubr.bf16.mxu0 %v519_v16  ;;  %2957 = vmatprep.mubr.bf16.mxu1 %v519_v16  ;;  %v495_v16 = vld [vmem:[%s5909_s13 + $0x378] sm:$0xff] }
 0x1c2   : > { %2504 = vmatpush1.bf16.msra.mxu0 %v5323_v17  ;;  %2956 = vmatpush1.bf16.msra.mxu1 %v5326_v18  ;;  %v558_v17 = vpack.c.bf16 %v478_v14, %v470_v13  ;;  %v567_v18 = vpack.c.bf16 %v495_v16, %v487_v15  ;;  %v5362_v14 = vld [vmem:[#allocation10 + $0x8] sm:$0xff]  }
 0x1c3   : > { %4392 = vmatprep.subr.bf16.mxu0 %v5329_v23  ;;  %4456 = vmatprep.subr.bf16.mxu1 %v5331_v24  ;;  %v566_v23 = vpack.c.bf16 %v494_v20, %v486_v19  ;;  %v575_v24 = vpack.c.bf16 %v511_v22, %v503_v21 }
 0x1c5   : > { %2506 = vmatmul.mubr.bf16.vlgmr.msra.gmra.mrb[0].mxu0 %v518_v25  ;;  %2958 = vmatmul.mubr.bf16.vlgmr.msra.gmra.mrb[0].mxu1 %v518_v25  ;;  %v502_v25 = vld [vmem:[%s5909_s13 + $0x3b0] sm:$0xff] }
 0x1c6   : > { %2515 = vmatprep.mubr.bf16.mxu0 %v527_v26  ;;  %2967 = vmatprep.mubr.bf16.mxu1 %v527_v26  ;;  %v510_v26 = vld [vmem:[%s5909_s13 + $0x3f0] sm:$0xff] }
 0x1c7   : > { %4393 = vmatpush3.bf16.msra.mxu0 %v5330_v27  ;;  %4457 = vmatpush3.bf16.msra.mxu1 %v5332_v28  ;;  %v574_v27 = vpack.c.bf16 %v510_v26, %v502_v25  ;;  %v5357_v28 = vld [vmem:[#allocation7 + $0x78] sm:$0xff]  }
 0x1c8   : > { %4394 = vmatprep.subr.bf16.mxu0 %v5333_v29  ;;  %4458 = vmatprep.subr.bf16.mxu1 %v5335_v30  ;;  %v5359_v29 = vld [vmem:[#allocation7 + $0xf8] sm:$0xff]  }
 0x1c9   : > { %v5358_v30 = vld [vmem:[#allocation7 + $0x38] sm:$0xff]  }
 0x1cb   : > { %4395 = vmatpush3.bf16.msra.mxu0 %v5334_v35  ;;  %4459 = vmatpush3.bf16.msra.mxu1 %v5336_v36  ;;  %v836_v35 = vsub.s32 0, %v835_v34  ;;  %v844_v36 = vsub.s32 2, %v835_v34 }
 0x1cc   : > { %4396 = vmatprep.subr.bf16.mxu0 %v5337_v37  ;;  %4460 = vmatprep.subr.bf16.mxu1 %v5339_v38  ;;  %v832_v37 = vld [vmem:[#allocation6] sm:$0xf]  ;;  %v840_v38 = vsub.s32 1, %v835_v34 }
 0x1cd   : > { %2516 = vmatmul.mubr.bf16.gmra.mrb[4].mxu0 %v526_v39  ;;  %2968 = vmatmul.mubr.bf16.gmra.mrb[4].mxu1 %v526_v39  ;;  %v848_v39 = vsub.s32 3, %v835_v34 }
 0x1ce   : > { %2525 = vmatprep.mubr.bf16.mxu0 %v535_v40  ;;  %2977 = vmatprep.mubr.bf16.mxu1 %v535_v40  ;;  %v6059_v40 = vrot.slane %v832_v37, %v836_v35 }
 0x1cf   : > { %4397 = vmatpush3.bf16.msra.mxu0 %v5338_v41  ;;  %4461 = vmatpush3.bf16.msra.mxu1 %v5340_v42  ;;  %v6061_v41 = vrot.slane %v832_v37, %v844_v36  ;;  %v6063_v42 = vrot.slane %v832_v37, %v840_v38 }
 0x1d0   : > { %4398 = vmatprep.subr.bf16.mxu0 %v5341_v43  ;;  %4462 = vmatprep.subr.bf16.mxu1 %v5343_v44  ;;  %v6065_v43 = vrot.slane %v832_v37, %v848_v39 }
 0x1d3   : > { %4399 = vmatpush3.bf16.msra.mxu0 %v5342_v49  ;;  %4463 = vmatpush3.bf16.msra.mxu1 %v5344_v50 }
 0x1d4   : > { %4400 = vmatprep.subr.bf16.mxu0 %v5345_v51  ;;  %4464 = vmatprep.subr.bf16.mxu1 %v5347_v52 }
 0x1d5   : > { %2526 = vmatmul.mubr.bf16.gmra.mrb[8].mxu0 %v534_v53  ;;  %2978 = vmatmul.mubr.bf16.gmra.mrb[8].mxu1 %v534_v53 }
 0x1d6   : > { %2535 = vmatprep.mubr.bf16.mxu0 %v543_v54  ;;  %2987 = vmatprep.mubr.bf16.mxu1 %v543_v54 }
 0x1d7   : > { %4401 = vmatpush3.bf16.msra.mxu0 %v5346_v55  ;;  %4465 = vmatpush3.bf16.msra.mxu1 %v5348_v56 }
 0x1d8   : > { %4402 = vmatprep.subr.bf16.mxu0 %v5349_v57  ;;  %4466 = vmatprep.subr.bf16.mxu1 %v5351_v58 }
 0x1db   : > { %4403 = vmatpush3.bf16.msra.mxu0 %v5350_v63  ;;  %4467 = vmatpush3.bf16.msra.mxu1 %v5352_v0 }
 0x1dc   : > { %4404 = vmatprep.subr.bf16.mxu0 %v5353_v1  ;;  %4468 = vmatprep.subr.bf16.mxu1 %v5355_v2 }
 0x1dd   : > { %2536 = vmatmul.mubr.bf16.gmra.mrb[12].mxu0 %v542_v3  ;;  %2988 = vmatmul.mubr.bf16.gmra.mrb[12].mxu1 %v542_v3 }
 0x1de   : > { %2545 = vmatprep.mubr.bf16.mxu0 %v551_v4  ;;  %2997 = vmatprep.mubr.bf16.mxu1 %v551_v4 }
 0x1df   : > { %4405 = vmatpush3.bf16.msra.mxu0 %v5354_v5  ;;  %4469 = vmatpush3.bf16.msra.mxu1 %v5356_v6 }
 0x1e0   : > { %4406 = vmatprep.subr.bf16.mxu0 %v5357_v28  ;;  %4470 = vmatprep.subr.bf16.mxu1 %v5359_v29  ;;  %v5363_v29 = vld [vmem:[#allocation10 + $0x10] sm:$0xff]  }
 0x1e3   : > { %4407 = vmatpush3.bf16.msra.mxu0 %v5358_v30  ;;  %4471 = vmatpush3.bf16.msra.mxu1 %v5360_v31 }
 0x1e4   : > { %4536 = vmatprep.subr.bf16.mxu0 %v6055_v32  ;;  %4568 = vmatprep.subr.bf16.mxu1 %v6055_v32 }
 0x1e5   : > { %2546 = vmatmul.mubr.bf16.gmra.mrb[16].mxu0 %v550_v11  ;;  %2998 = vmatmul.mubr.bf16.gmra.mrb[16].mxu1 %v550_v11 }
 0x1e6   : > { %2555 = vmatprep.mubr.bf16.mxu0 %v559_v12  ;;  %3007 = vmatprep.mubr.bf16.mxu1 %v559_v12 }
 0x1ed   : > { %2556 = vmatmul.mubr.bf16.gmra.mrb[20].mxu0 %v558_v17  ;;  %3008 = vmatmul.mubr.bf16.gmra.mrb[20].mxu1 %v558_v17 }
 0x1ee   : > { %2565 = vmatprep.mubr.bf16.mxu0 %v567_v18  ;;  %3017 = vmatprep.mubr.bf16.mxu1 %v567_v18 }
 0x1f5   : > { %2566 = vmatmul.mubr.bf16.gmra.mrb[24].mxu0 %v566_v23  ;;  %3018 = vmatmul.mubr.bf16.gmra.mrb[24].mxu1 %v566_v23 }
 0x1f6   : > { %2575 = vmatprep.mubr.bf16.mxu0 %v575_v24  ;;  %3027 = vmatprep.mubr.bf16.mxu1 %v575_v24 }
 0x1fd   : > { %2576 = vmatmul.mubr.bf16.gmra.mrb[28].mxu0 %v574_v27  ;;  %3028 = vmatmul.mubr.bf16.gmra.mrb[28].mxu1 %v574_v27 }
 0x298   : > { %v2507_v44 = vpop.f32.mrb[0].mxu0  ;;  %v2959_v45 = vpop.f32.mrb[0].mxu1 }
 0x299   : > { %v4584_v46 = vadd.f32 %v2507_v44, %v6059_v40  ;;  %v4616_v47 = vadd.f32 %v2959_v45, %v6061_v41  ;;  %v2509_v48 = vpop.f32.mrb[1].mxu0  ;;  %v2961_v49 = vpop.f32.mrb[1].mxu1 }
 0x29a   : > { %v4585_v50 = vadd.f32 %v2509_v48, %v6063_v42  ;;  %v4617_v51 = vadd.f32 %v2961_v49, %v6065_v43  ;;  %v2511_v52 = vpop.f32.mrb[2].mxu0  ;;  %v2963_v53 = vpop.f32.mrb[2].mxu1 }
 0x29b   : > { %v4586_v54 = vadd.f32 %v2511_v52, %v6059_v40  ;;  %v4618_v55 = vadd.f32 %v2963_v53, %v6061_v41  ;;  %v2513_v56 = vpop.f32.mrb[3].mxu0  ;;  %v2965_v57 = vpop.f32.mrb[3].mxu1  ;;  %v3038_v60 = vmax.f32 %v4584_v46, 0.0  ;;  %v3040_v61 = vmax.f32 %v4616_v47, 0.0 }
 0x29c   : > { %v4587_v58 = vadd.f32 %v2513_v56, %v6063_v42  ;;  %v4619_v59 = vadd.f32 %v2965_v57, %v6065_v43  ;;  %v3039_v0 = vmax.f32 %v4585_v50, 0.0  ;;  %v3041_v1 = vmax.f32 %v4617_v51, 0.0 }
 0x29d   : > { %v3042_v62 = vmax.f32 %v4586_v54, 0.0  ;;  %v3044_v63 = vmax.f32 %v4618_v55, 0.0 }
 0x29e   : > { %v3043_v2 = vmax.f32 %v4587_v58, 0.0  ;;  %v3045_v3 = vmax.f32 %v4619_v59, 0.0 }
 0x29f   : > { %v3102_v4 = vpack.c.bf16 %v3042_v62, %v3038_v60  ;;  %v3104_v5 = vpack.c.bf16 %v3044_v63, %v3040_v61 }
 0x2a0   : > { %v3103_v6 = vpack.c.bf16 %v3043_v2, %v3039_v0  ;;  %v3105_v7 = vpack.c.bf16 %v3045_v3, %v3041_v1  ;;  %v2517_v8 = vpop.f32.mrb[4].mxu0  ;;  %v2969_v9 = vpop.f32.mrb[4].mxu1 }
 0x2a1   : > { %v4588_v10 = vadd.f32 %v2517_v8, %v6059_v40  ;;  %v4620_v11 = vadd.f32 %v2969_v9, %v6061_v41  ;;  %v2519_v12 = vpop.f32.mrb[5].mxu0  ;;  %v2971_v13 = vpop.f32.mrb[5].mxu1 }
 0x2a2   : > { %v4589_v15 = vadd.f32 %v2519_v12, %v6063_v42  ;;  %v4621_v16 = vadd.f32 %v2971_v13, %v6065_v43  ;;  %v2521_v17 = vpop.f32.mrb[6].mxu0  ;;  %v2973_v18 = vpop.f32.mrb[6].mxu1  ;;  %3429 = vmatprep.mubr.bf16.mxu0 %v3103_v6  ;;  %3526 = vmatprep.mubr.bf16.mxu1 %v3105_v7 }
 0x2a3   : > { %v4590_v19 = vadd.f32 %v2521_v17, %v6059_v40  ;;  %v4622_v20 = vadd.f32 %v2973_v18, %v6061_v41  ;;  %v2523_v21 = vpop.f32.mrb[7].mxu0  ;;  %v2975_v22 = vpop.f32.mrb[7].mxu1  ;;  %3430 = vmatmul.mubr.bf16.vlgmr.msra.gmra.mrb[32].mxu0 %v3102_v4  ;;  %3527 = vmatmul.mubr.bf16.vlgmr.msra.gmra.mrb[32].mxu1 %v3104_v5  ;;  %v3046_v25 = vmax.f32 %v4588_v10, 0.0  ;;  %v3048_v26 = vmax.f32 %v4620_v11, 0.0 }
 0x2a4   : > { %v4591_v23 = vadd.f32 %v2523_v21, %v6063_v42  ;;  %v4623_v24 = vadd.f32 %v2975_v22, %v6065_v43  ;;  %4537 = vmatpush3.bf16.msra.mxu0 %v6055_v32  ;;  %4576 = vmatpush3.bf16.msra.mxu1 %v6055_v32  ;;  %v3047_v30 = vmax.f32 %v4589_v15, 0.0  ;;  %v3049_v31 = vmax.f32 %v4621_v16, 0.0 }
 0x2a5   : > { %v3050_v27 = vmax.f32 %v4590_v19, 0.0  ;;  %v3052_v28 = vmax.f32 %v4622_v20, 0.0  ;;  %4538 = vmatprep.subr.bf16.mxu0 %v5362_v14  ;;  %4569 = vmatprep.subr.bf16.mxu1 %v5362_v14 }
 0x2a6   : > { %v3051_v33 = vmax.f32 %v4591_v23, 0.0  ;;  %v3053_v34 = vmax.f32 %v4623_v24, 0.0 }
 0x2a7   : > { %v3106_v35 = vpack.c.bf16 %v3050_v27, %v3046_v25  ;;  %v3108_v36 = vpack.c.bf16 %v3052_v28, %v3048_v26 }
 0x2a8   : > { %v3107_v37 = vpack.c.bf16 %v3051_v33, %v3047_v30  ;;  %v3109_v38 = vpack.c.bf16 %v3053_v34, %v3049_v31  ;;  %v2527_v39 = vpop.f32.mrb[8].mxu0  ;;  %v2979_v44 = vpop.f32.mrb[8].mxu1  ;;  %4539 = vmatpush3.bf16.msra.mxu0 %v5362_v14  ;;  %4577 = vmatpush3.bf16.msra.mxu1 %v5362_v14 }
 0x2a9   : > { %v4592_v32 = vadd.f32 %v2527_v39, %v6059_v40  ;;  %v4624_v45 = vadd.f32 %v2979_v44, %v6061_v41  ;;  %v2529_v46 = vpop.f32.mrb[9].mxu0  ;;  %v2981_v47 = vpop.f32.mrb[9].mxu1  ;;  %4540 = vmatprep.subr.bf16.mxu0 %v5363_v29  ;;  %4570 = vmatprep.subr.bf16.mxu1 %v5363_v29 }
 0x2aa   : > { %v4593_v48 = vadd.f32 %v2529_v46, %v6063_v42  ;;  %v4625_v49 = vadd.f32 %v2981_v47, %v6065_v43  ;;  %v2531_v50 = vpop.f32.mrb[10].mxu0  ;;  %v2983_v51 = vpop.f32.mrb[10].mxu1  ;;  %3437 = vmatprep.mubr.bf16.mxu0 %v3107_v37  ;;  %3534 = vmatprep.mubr.bf16.mxu1 %v3109_v38 }
 0x2ab   : > { %v4594_v52 = vadd.f32 %v2531_v50, %v6059_v40  ;;  %v4626_v53 = vadd.f32 %v2983_v51, %v6061_v41  ;;  %v2533_v54 = vpop.f32.mrb[11].mxu0  ;;  %v2985_v55 = vpop.f32.mrb[11].mxu1  ;;  %3438 = vmatmul.mubr.bf16.gmra.mrb[36].mxu0 %v3106_v35  ;;  %3535 = vmatmul.mubr.bf16.gmra.mrb[36].mxu1 %v3108_v36  ;;  %v3054_v58 = vmax.f32 %v4592_v32, 0.0  ;;  %v3056_v59 = vmax.f32 %v4624_v45, 0.0 }
 0x2ac   : > { %v4595_v56 = vadd.f32 %v2533_v54, %v6063_v42  ;;  %v4627_v57 = vadd.f32 %v2985_v55, %v6065_v43  ;;  %4541 = vmatpush3.bf16.msra.mxu0 %v5363_v29  ;;  %4578 = vmatpush3.bf16.msra.mxu1 %v5363_v29  ;;  %v3055_v62 = vmax.f32 %v4593_v48, 0.0  ;;  %v3057_v63 = vmax.f32 %v4625_v49, 0.0 }
 0x2ad   : > { %v3058_v60 = vmax.f32 %v4594_v52, 0.0  ;;  %v3060_v61 = vmax.f32 %v4626_v53, 0.0 }
 0x2ae   : > { %v3059_v0 = vmax.f32 %v4595_v56, 0.0  ;;  %v3061_v1 = vmax.f32 %v4627_v57, 0.0 }
 0x2af   : > { %v3110_v2 = vpack.c.bf16 %v3058_v60, %v3054_v58  ;;  %v3112_v3 = vpack.c.bf16 %v3060_v61, %v3056_v59 }
 0x2b0   : > { %v3111_v4 = vpack.c.bf16 %v3059_v0, %v3055_v62  ;;  %v3113_v5 = vpack.c.bf16 %v3061_v1, %v3057_v63  ;;  %v2537_v6 = vpop.f32.mrb[12].mxu0  ;;  %v2989_v7 = vpop.f32.mrb[12].mxu1 }
 0x2b1   : > { %v4596_v8 = vadd.f32 %v2537_v6, %v6059_v40  ;;  %v4628_v9 = vadd.f32 %v2989_v7, %v6061_v41  ;;  %v2539_v10 = vpop.f32.mrb[13].mxu0  ;;  %v2991_v11 = vpop.f32.mrb[13].mxu1 }
 0x2b2   : > { %v4597_v12 = vadd.f32 %v2539_v10, %v6063_v42  ;;  %v4629_v13 = vadd.f32 %v2991_v11, %v6065_v43  ;;  %v2541_v14 = vpop.f32.mrb[14].mxu0  ;;  %v2993_v15 = vpop.f32.mrb[14].mxu1  ;;  %3445 = vmatprep.mubr.bf16.mxu0 %v3111_v4  ;;  %3542 = vmatprep.mubr.bf16.mxu1 %v3113_v5 }
 0x2b3   : > { %v4598_v16 = vadd.f32 %v2541_v14, %v6059_v40  ;;  %v4630_v17 = vadd.f32 %v2993_v15, %v6061_v41  ;;  %v2543_v18 = vpop.f32.mrb[15].mxu0  ;;  %v2995_v19 = vpop.f32.mrb[15].mxu1  ;;  %3446 = vmatmul.mubr.bf16.gmra.mrb[40].mxu0 %v3110_v2  ;;  %3543 = vmatmul.mubr.bf16.gmra.mrb[40].mxu1 %v3112_v3  ;;  %v3062_v22 = vmax.f32 %v4596_v8, 0.0  ;;  %v3064_v23 = vmax.f32 %v4628_v9, 0.0 }
 0x2b4   : > { %v4599_v20 = vadd.f32 %v2543_v18, %v6063_v42  ;;  %v4631_v21 = vadd.f32 %v2995_v19, %v6065_v43  ;;  %v3063_v26 = vmax.f32 %v4597_v12, 0.0  ;;  %v3065_v27 = vmax.f32 %v4629_v13, 0.0 }
 0x2b5   : > { %v3066_v24 = vmax.f32 %v4598_v16, 0.0  ;;  %v3068_v25 = vmax.f32 %v4630_v17, 0.0 }
 0x2b6   : > { %v3067_v28 = vmax.f32 %v4599_v20, 0.0  ;;  %v3069_v29 = vmax.f32 %v4631_v21, 0.0 }
 0x2b7   : > { %v3114_v30 = vpack.c.bf16 %v3066_v24, %v3062_v22  ;;  %v3116_v31 = vpack.c.bf16 %v3068_v25, %v3064_v23 }
 0x2b8   : > { %v3115_v33 = vpack.c.bf16 %v3067_v28, %v3063_v26  ;;  %v3117_v34 = vpack.c.bf16 %v3069_v29, %v3065_v27  ;;  %v2547_v35 = vpop.f32.mrb[16].mxu0  ;;  %v2999_v36 = vpop.f32.mrb[16].mxu1 }
 0x2b9   : > { %v4600_v37 = vadd.f32 %v2547_v35, %v6059_v40  ;;  %v4632_v38 = vadd.f32 %v2999_v36, %v6061_v41  ;;  %v2549_v39 = vpop.f32.mrb[17].mxu0  ;;  %v3001_v44 = vpop.f32.mrb[17].mxu1 }
 0x2ba   : > { %v4601_v32 = vadd.f32 %v2549_v39, %v6063_v42  ;;  %v4633_v45 = vadd.f32 %v3001_v44, %v6065_v43  ;;  %v2551_v46 = vpop.f32.mrb[18].mxu0  ;;  %v3003_v47 = vpop.f32.mrb[18].mxu1  ;;  %3453 = vmatprep.mubr.bf16.mxu0 %v3115_v33  ;;  %3550 = vmatprep.mubr.bf16.mxu1 %v3117_v34 }
 0x2bb   : > { %v4602_v48 = vadd.f32 %v2551_v46, %v6059_v40  ;;  %v4634_v49 = vadd.f32 %v3003_v47, %v6061_v41  ;;  %v2553_v50 = vpop.f32.mrb[19].mxu0  ;;  %v3005_v51 = vpop.f32.mrb[19].mxu1  ;;  %3454 = vmatmul.mubr.bf16.gmra.mrb[44].mxu0 %v3114_v30  ;;  %3551 = vmatmul.mubr.bf16.gmra.mrb[44].mxu1 %v3116_v31  ;;  %v3070_v54 = vmax.f32 %v4600_v37, 0.0  ;;  %v3072_v55 = vmax.f32 %v4632_v38, 0.0 }
 0x2bc   : > { %v4603_v52 = vadd.f32 %v2553_v50, %v6063_v42  ;;  %v4635_v53 = vadd.f32 %v3005_v51, %v6065_v43  ;;  %v3071_v58 = vmax.f32 %v4601_v32, 0.0  ;;  %v3073_v59 = vmax.f32 %v4633_v45, 0.0 }
 0x2bd   : > { %v3074_v56 = vmax.f32 %v4602_v48, 0.0  ;;  %v3076_v57 = vmax.f32 %v4634_v49, 0.0 }
 0x2be   : > { %v3075_v60 = vmax.f32 %v4603_v52, 0.0  ;;  %v3077_v61 = vmax.f32 %v4635_v53, 0.0 }
 0x2bf   : > { %v3118_v62 = vpack.c.bf16 %v3074_v56, %v3070_v54  ;;  %v3120_v63 = vpack.c.bf16 %v3076_v57, %v3072_v55 }
 0x2c0   : > { %v3119_v0 = vpack.c.bf16 %v3075_v60, %v3071_v58  ;;  %v3121_v1 = vpack.c.bf16 %v3077_v61, %v3073_v59  ;;  %v2557_v2 = vpop.f32.mrb[20].mxu0  ;;  %v3009_v3 = vpop.f32.mrb[20].mxu1 }
 0x2c1   : > { %v4604_v4 = vadd.f32 %v2557_v2, %v6059_v40  ;;  %v4636_v5 = vadd.f32 %v3009_v3, %v6061_v41  ;;  %v2559_v6 = vpop.f32.mrb[21].mxu0  ;;  %v3011_v7 = vpop.f32.mrb[21].mxu1 }
 0x2c2   : > { %v4605_v8 = vadd.f32 %v2559_v6, %v6063_v42  ;;  %v4637_v9 = vadd.f32 %v3011_v7, %v6065_v43  ;;  %v2561_v10 = vpop.f32.mrb[22].mxu0  ;;  %v3013_v11 = vpop.f32.mrb[22].mxu1  ;;  %3461 = vmatprep.mubr.bf16.mxu0 %v3119_v0  ;;  %3558 = vmatprep.mubr.bf16.mxu1 %v3121_v1 }
 0x2c3   : > { %v4606_v12 = vadd.f32 %v2561_v10, %v6059_v40  ;;  %v4638_v13 = vadd.f32 %v3013_v11, %v6061_v41  ;;  %v2563_v14 = vpop.f32.mrb[23].mxu0  ;;  %v3015_v15 = vpop.f32.mrb[23].mxu1  ;;  %3462 = vmatmul.mubr.bf16.gmra.mrb[48].mxu0 %v3118_v62  ;;  %3559 = vmatmul.mubr.bf16.gmra.mrb[48].mxu1 %v3120_v63  ;;  %v3078_v18 = vmax.f32 %v4604_v4, 0.0  ;;  %v3080_v19 = vmax.f32 %v4636_v5, 0.0 }
 0x2c4   : > { %v4607_v16 = vadd.f32 %v2563_v14, %v6063_v42  ;;  %v4639_v17 = vadd.f32 %v3015_v15, %v6065_v43  ;;  %v3079_v22 = vmax.f32 %v4605_v8, 0.0  ;;  %v3081_v23 = vmax.f32 %v4637_v9, 0.0 }
 0x2c5   : > { %v3082_v20 = vmax.f32 %v4606_v12, 0.0  ;;  %v3084_v21 = vmax.f32 %v4638_v13, 0.0 }
 0x2c6   : > { %v3083_v24 = vmax.f32 %v4607_v16, 0.0  ;;  %v3085_v25 = vmax.f32 %v4639_v17, 0.0 }
 0x2c7   : > { %v3122_v26 = vpack.c.bf16 %v3082_v20, %v3078_v18  ;;  %v3124_v27 = vpack.c.bf16 %v3084_v21, %v3080_v19 }
 0x2c8   : > { %v3123_v28 = vpack.c.bf16 %v3083_v24, %v3079_v22  ;;  %v3125_v29 = vpack.c.bf16 %v3085_v25, %v3081_v23  ;;  %v2567_v30 = vpop.f32.mrb[24].mxu0  ;;  %v3019_v31 = vpop.f32.mrb[24].mxu1  ;;  %v5364_v24 = vld [vmem:[#allocation10 + $0x18] sm:$0xff]   ;;  %v5367_v25 = vld [vmem:[#allocation10 + $0x30] sm:$0xff]  }
 0x2c9   : > { %v4608_v33 = vadd.f32 %v2567_v30, %v6059_v40  ;;  %v4640_v34 = vadd.f32 %v3019_v31, %v6061_v41  ;;  %v2569_v35 = vpop.f32.mrb[25].mxu0  ;;  %v3021_v36 = vpop.f32.mrb[25].mxu1  ;;  %4542 = vmatprep.subr.bf16.mxu0 %v5364_v24  ;;  %4571 = vmatprep.subr.bf16.mxu1 %v5364_v24 }
 0x2ca   : > { %v4609_v37 = vadd.f32 %v2569_v35, %v6063_v42  ;;  %v4641_v38 = vadd.f32 %v3021_v36, %v6065_v43  ;;  %v2571_v39 = vpop.f32.mrb[26].mxu0  ;;  %v3023_v44 = vpop.f32.mrb[26].mxu1  ;;  %3469 = vmatprep.mubr.bf16.mxu0 %v3123_v28  ;;  %3566 = vmatprep.mubr.bf16.mxu1 %v3125_v29  ;;  %v6133_v29 = vld [vmem:[#allocation9] ss:$0 sm:$0xff] }
 0x2cb   : > { %v4610_v32 = vadd.f32 %v2571_v39, %v6059_v40  ;;  %v4642_v45 = vadd.f32 %v3023_v44, %v6061_v41  ;;  %v2573_v46 = vpop.f32.mrb[27].mxu0  ;;  %v3025_v47 = vpop.f32.mrb[27].mxu1  ;;  %3470 = vmatmul.mubr.bf16.gmra.mrb[52].mxu0 %v3122_v26  ;;  %3567 = vmatmul.mubr.bf16.gmra.mrb[52].mxu1 %v3124_v27  ;;  %v3086_v50 = vmax.f32 %v4608_v33, 0.0  ;;  %v3088_v51 = vmax.f32 %v4640_v34, 0.0  ;;  %v5368_v26 = vld [vmem:[#allocation10 + $0x38] sm:$0xff]  }
 0x2cc   : > { %v4611_v48 = vadd.f32 %v2573_v46, %v6063_v42  ;;  %v4643_v49 = vadd.f32 %v3025_v47, %v6065_v43  ;;  %v3087_v54 = vmax.f32 %v4609_v37, 0.0  ;;  %v3089_v55 = vmax.f32 %v4641_v38, 0.0  ;;  %4543 = vmatpush3.bf16.msra.mxu0 %v5364_v24  ;;  %4579 = vmatpush3.bf16.msra.mxu1 %v5364_v24 }
 0x2cd   : > { %v3090_v52 = vmax.f32 %v4610_v32, 0.0  ;;  %v3092_v53 = vmax.f32 %v4642_v45, 0.0 }
 0x2ce   : > { %v3091_v56 = vmax.f32 %v4611_v48, 0.0  ;;  %v3093_v57 = vmax.f32 %v4643_v49, 0.0 }
 0x2cf   : > { %v3126_v58 = vpack.c.bf16 %v3090_v52, %v3086_v50  ;;  %v3128_v59 = vpack.c.bf16 %v3092_v53, %v3088_v51 }
 0x2d0   : > { %v3127_v60 = vpack.c.bf16 %v3091_v56, %v3087_v54  ;;  %v3129_v61 = vpack.c.bf16 %v3093_v57, %v3089_v55  ;;  %v2577_v62 = vpop.f32.mrb[28].mxu0  ;;  %v3029_v63 = vpop.f32.mrb[28].mxu1 }
 0x2d1   : > { %v4612_v0 = vadd.f32 %v2577_v62, %v6059_v40  ;;  %v4644_v1 = vadd.f32 %v3029_v63, %v6061_v41  ;;  %v2579_v2 = vpop.f32.mrb[29].mxu0  ;;  %v3031_v3 = vpop.f32.mrb[29].mxu1 }
 0x2d2   : > { %v4613_v4 = vadd.f32 %v2579_v2, %v6063_v42  ;;  %v4645_v5 = vadd.f32 %v3031_v3, %v6065_v43  ;;  %v2581_v6 = vpop.f32.mrb[30].mxu0  ;;  %v3033_v7 = vpop.f32.mrb[30].mxu1  ;;  %3477 = vmatprep.mubr.bf16.mxu0 %v3127_v60  ;;  %3574 = vmatprep.mubr.bf16.mxu1 %v3129_v61 }
 0x2d3   : > { %v4614_v8 = vadd.f32 %v2581_v6, %v6059_v40  ;;  %v4646_v9 = vadd.f32 %v3033_v7, %v6061_v41  ;;  %v2583_v10 = vpop.f32.mrb[31].mxu0  ;;  %v3035_v11 = vpop.f32.mrb[31].mxu1  ;;  %3478 = vmatmul.mubr.bf16.gmra.mrb[56].mxu0 %v3126_v58  ;;  %3575 = vmatmul.mubr.bf16.gmra.mrb[56].mxu1 %v3128_v59  ;;  %v3094_v14 = vmax.f32 %v4612_v0, 0.0  ;;  %v3096_v15 = vmax.f32 %v4644_v1, 0.0 }
 0x2d4   : > { %v4615_v12 = vadd.f32 %v2583_v10, %v6063_v42  ;;  %v4647_v13 = vadd.f32 %v3035_v11, %v6065_v43  ;;  %v3095_v18 = vmax.f32 %v4613_v4, 0.0  ;;  %v3097_v19 = vmax.f32 %v4645_v5, 0.0  ;;  %v5365_v42 = vld [vmem:[#allocation10 + $0x20] sm:$0xff]   ;;  %v5366_v43 = vld [vmem:[#allocation10 + $0x28] sm:$0xff]  }
 0x2d5   : > { %v3098_v16 = vmax.f32 %v4614_v8, 0.0  ;;  %v3100_v17 = vmax.f32 %v4646_v9, 0.0  ;;  %4544 = vmatprep.subr.bf16.mxu0 %v5365_v42  ;;  %4572 = vmatprep.subr.bf16.mxu1 %v5365_v42 }
 0x2d6   : > { %v3099_v20 = vmax.f32 %v4615_v12, 0.0  ;;  %v3101_v21 = vmax.f32 %v4647_v13, 0.0  ;;  %4545 = vmatpush3.bf16.msra.mxu0 %v5365_v42  ;;  %4580 = vmatpush3.bf16.msra.mxu1 %v5365_v42 }
 0x2d7   : > { %v3130_v22 = vpack.c.bf16 %v3098_v16, %v3094_v14  ;;  %v3132_v40 = vpack.c.bf16 %v3100_v17, %v3096_v15  ;;  %4546 = vmatprep.subr.bf16.mxu0 %v5366_v43  ;;  %4573 = vmatprep.subr.bf16.mxu1 %v5366_v43 }
 0x2d8   : > { %v3131_v23 = vpack.c.bf16 %v3099_v20, %v3095_v18  ;;  %v3133_v41 = vpack.c.bf16 %v3101_v21, %v3097_v19 }
 0x2da   : > { %3485 = vmatprep.mubr.bf16.mxu0 %v3131_v23  ;;  %3582 = vmatprep.mubr.bf16.mxu1 %v3133_v41 }
 0x2db   : > { %3486 = vmatmul.mubr.bf16.gmra.mrb[60].mxu0 %v3130_v22  ;;  %3583 = vmatmul.mubr.bf16.gmra.mrb[60].mxu1 %v3132_v40 }
 0x2dc   : > { %4547 = vmatpush3.bf16.msra.mxu0 %v5366_v43  ;;  %4581 = vmatpush3.bf16.msra.mxu1 %v5366_v43 }
 0x2dd   : > { %4548 = vmatprep.subr.bf16.mxu0 %v5367_v25  ;;  %4574 = vmatprep.subr.bf16.mxu1 %v5367_v25 }
 0x2e0   : > { %4549 = vmatpush3.bf16.msra.mxu0 %v5367_v25  ;;  %4582 = vmatpush3.bf16.msra.mxu1 %v5367_v25 }
 0x2e1   : > { %4550 = vmatprep.subr.bf16.mxu0 %v5368_v26  ;;  %4575 = vmatprep.subr.bf16.mxu1 %v5368_v26 }
 0x2e4   : > { %4551 = vmatpush3.bf16.msra.mxu0 %v5368_v26  ;;  %4583 = vmatpush3.bf16.msra.mxu1 %v5368_v26 }
 0x376   : > { %v4408_v27 = vpop.f32.mrb[32].mxu0  ;;  %v4472_v28 = vpop.f32.mrb[32].mxu1 }
 0x377   : > { %v4409_v30 = vpop.f32.mrb[33].mxu0  ;;  %v4473_v31 = vpop.f32.mrb[33].mxu1 }
 0x378   : > { %v4410_v33 = vadd.f32 %v4409_v30, %v4408_v27  ;;  %v4474_v34 = vadd.f32 %v4473_v31, %v4472_v28  ;;  %v4411_v35 = vpop.f32.mrb[34].mxu0  ;;  %v4475_v36 = vpop.f32.mrb[34].mxu1 }
 0x379   : > { %v4412_v37 = vpop.f32.mrb[35].mxu0  ;;  %v4476_v38 = vpop.f32.mrb[35].mxu1 }
 0x37a   : > { %v3432_v39 = vadd.f32 %v4410_v33, %v6133_v29  ;;  %v4413_v44 = vadd.f32 %v4412_v37, %v4411_v35  ;;  %v4477_v32 = vadd.f32 %v4476_v38, %v4475_v36 }
 0x37c   : > { %v3529_v45 = vadd.f32 %v4474_v34, %v3432_v39  ;;  %v3435_v46 = vadd.f32 %v4413_v44, %v6133_v29 }
 0x37e   : > { %v3532_v47 = vadd.f32 %v4477_v32, %v3435_v46  ;;  %v4414_v48 = vpop.f32.mrb[36].mxu0  ;;  %v4478_v49 = vpop.f32.mrb[36].mxu1  ;;  %v3591_v52 = vmax.f32 %v3529_v45, 0.0 }
 0x37f   : > { %v4415_v50 = vpop.f32.mrb[37].mxu0  ;;  %v4479_v51 = vpop.f32.mrb[37].mxu1 }
 0x380   : > { %v3592_v53 = vmax.f32 %v3532_v47, 0.0  ;;  %v4416_v54 = vadd.f32 %v4415_v50, %v4414_v48  ;;  %v4480_v55 = vadd.f32 %v4479_v51, %v4478_v49  ;;  %v4417_v56 = vpop.f32.mrb[38].mxu0  ;;  %v4481_v57 = vpop.f32.mrb[38].mxu1 }
 0x381   : > { %v4418_v58 = vpop.f32.mrb[39].mxu0  ;;  %v4482_v59 = vpop.f32.mrb[39].mxu1 }
 0x382   : > { %v3440_v60 = vadd.f32 %v4416_v54, %v6133_v29  ;;  %v4419_v61 = vadd.f32 %v4418_v58, %v4417_v56  ;;  %v4483_v62 = vadd.f32 %v4482_v59, %v4481_v57  ;;  %v3607_v63 = vpack.c.bf16 %v3592_v53, %v3591_v52 }
 0x384   : > { %v3537_v0 = vadd.f32 %v4480_v55, %v3440_v60  ;;  %v3443_v1 = vadd.f32 %v4419_v61, %v6133_v29  ;;  %4552 = vmatprep.mubr.bf16.mxu0 %v3607_v63 }
 0x386   : > { %v3540_v2 = vadd.f32 %v4483_v62, %v3443_v1  ;;  %v4420_v3 = vpop.f32.mrb[40].mxu0  ;;  %v4484_v4 = vpop.f32.mrb[40].mxu1  ;;  %v3593_v7 = vmax.f32 %v3537_v0, 0.0 }
 0x387   : > { %v4421_v5 = vpop.f32.mrb[41].mxu0  ;;  %v4485_v6 = vpop.f32.mrb[41].mxu1 }
 0x388   : > { %v3594_v8 = vmax.f32 %v3540_v2, 0.0  ;;  %v4422_v9 = vadd.f32 %v4421_v5, %v4420_v3  ;;  %v4486_v10 = vadd.f32 %v4485_v6, %v4484_v4  ;;  %v4423_v11 = vpop.f32.mrb[42].mxu0  ;;  %v4487_v12 = vpop.f32.mrb[42].mxu1 }
 0x389   : > { %v4424_v13 = vpop.f32.mrb[43].mxu0  ;;  %v4488_v14 = vpop.f32.mrb[43].mxu1 }
 0x38a   : > { %v3608_v15 = vpack.c.bf16 %v3594_v8, %v3593_v7  ;;  %v3448_v16 = vadd.f32 %v4422_v9, %v6133_v29  ;;  %v4425_v17 = vadd.f32 %v4424_v13, %v4423_v11  ;;  %v4489_v18 = vadd.f32 %v4488_v14, %v4487_v12 }
 0x38c   : > { %v3545_v19 = vadd.f32 %v4486_v10, %v3448_v16  ;;  %v3451_v20 = vadd.f32 %v4425_v17, %v6133_v29  ;;  %4553 = vmatmul.mubr.bf16.vlgmr.msra.gmra.mrb[64].mxu0 %v3608_v15 }
 0x38e   : > { %v3548_v21 = vadd.f32 %v4489_v18, %v3451_v20  ;;  %v4426_v22 = vpop.f32.mrb[44].mxu0  ;;  %v4490_v40 = vpop.f32.mrb[44].mxu1  ;;  %v3595_v24 = vmax.f32 %v3545_v19, 0.0 }
 0x38f   : > { %v4427_v23 = vpop.f32.mrb[45].mxu0  ;;  %v4491_v41 = vpop.f32.mrb[45].mxu1 }
 0x390   : > { %v3596_v42 = vmax.f32 %v3548_v21, 0.0  ;;  %v4428_v43 = vadd.f32 %v4427_v23, %v4426_v22  ;;  %v4492_v25 = vadd.f32 %v4491_v41, %v4490_v40  ;;  %v4429_v26 = vpop.f32.mrb[46].mxu0  ;;  %v4493_v27 = vpop.f32.mrb[46].mxu1 }
 0x391   : > { %v4430_v28 = vpop.f32.mrb[47].mxu0  ;;  %v4494_v30 = vpop.f32.mrb[47].mxu1 }
 0x392   : > { %v3456_v31 = vadd.f32 %v4428_v43, %v6133_v29  ;;  %v4431_v33 = vadd.f32 %v4430_v28, %v4429_v26  ;;  %v4495_v34 = vadd.f32 %v4494_v30, %v4493_v27  ;;  %v3609_v35 = vpack.c.bf16 %v3596_v42, %v3595_v24 }
 0x394   : > { %v3553_v36 = vadd.f32 %v4492_v25, %v3456_v31  ;;  %v3459_v37 = vadd.f32 %v4431_v33, %v6133_v29  ;;  %4556 = vmatprep.mubr.bf16.mxu0 %v3609_v35 }
 0x396   : > { %v3556_v38 = vadd.f32 %v4495_v34, %v3459_v37  ;;  %v4432_v39 = vpop.f32.mrb[48].mxu0  ;;  %v4496_v44 = vpop.f32.mrb[48].mxu1  ;;  %v3597_v46 = vmax.f32 %v3553_v36, 0.0 }
 0x397   : > { %v4433_v32 = vpop.f32.mrb[49].mxu0  ;;  %v4497_v45 = vpop.f32.mrb[49].mxu1 }
 0x398   : > { %v3598_v47 = vmax.f32 %v3556_v38, 0.0  ;;  %v4434_v48 = vadd.f32 %v4433_v32, %v4432_v39  ;;  %v4498_v49 = vadd.f32 %v4497_v45, %v4496_v44  ;;  %v4435_v50 = vpop.f32.mrb[50].mxu0  ;;  %v4499_v51 = vpop.f32.mrb[50].mxu1 }
 0x399   : > { %v4436_v52 = vpop.f32.mrb[51].mxu0  ;;  %v4500_v53 = vpop.f32.mrb[51].mxu1 }
 0x39a   : > { %v3464_v54 = vadd.f32 %v4434_v48, %v6133_v29  ;;  %v4437_v55 = vadd.f32 %v4436_v52, %v4435_v50  ;;  %v4501_v56 = vadd.f32 %v4500_v53, %v4499_v51  ;;  %v3610_v57 = vpack.c.bf16 %v3598_v47, %v3597_v46 }
 0x39c   : > { %v3561_v58 = vadd.f32 %v4498_v49, %v3464_v54  ;;  %v3467_v59 = vadd.f32 %v4437_v55, %v6133_v29  ;;  %4557 = vmatmul.mubr.bf16.gmra.mrb[68].mxu0 %v3610_v57 }
 0x39e   : > { %v3564_v60 = vadd.f32 %v4501_v56, %v3467_v59  ;;  %v4438_v61 = vpop.f32.mrb[52].mxu0  ;;  %v4502_v62 = vpop.f32.mrb[52].mxu1  ;;  %v3599_v1 = vmax.f32 %v3561_v58, 0.0  ;;  %v4300_v59 = vld [vmem:[#allocation12] ss:$0 sm:$0xff] }
 0x39f   : > { %v4439_v63 = vpop.f32.mrb[53].mxu0  ;;  %v4503_v0 = vpop.f32.mrb[53].mxu1 }
 0x3a0   : > { %v3600_v2 = vmax.f32 %v3564_v60, 0.0  ;;  %v4440_v3 = vadd.f32 %v4439_v63, %v4438_v61  ;;  %v4504_v4 = vadd.f32 %v4503_v0, %v4502_v62  ;;  %v4441_v5 = vpop.f32.mrb[54].mxu0  ;;  %v4505_v6 = vpop.f32.mrb[54].mxu1 }
 0x3a1   : > { %v4442_v7 = vpop.f32.mrb[55].mxu0  ;;  %v4506_v8 = vpop.f32.mrb[55].mxu1 }
 0x3a2   : > { %v3472_v9 = vadd.f32 %v4440_v3, %v6133_v29  ;;  %v4443_v10 = vadd.f32 %v4442_v7, %v4441_v5  ;;  %v4507_v11 = vadd.f32 %v4506_v8, %v4505_v6  ;;  %v3611_v12 = vpack.c.bf16 %v3600_v2, %v3599_v1 }
 0x3a4   : > { %v3569_v13 = vadd.f32 %v4504_v4, %v3472_v9  ;;  %v3475_v14 = vadd.f32 %v4443_v10, %v6133_v29  ;;  %4560 = vmatprep.mubr.bf16.mxu1 %v3611_v12 }
 0x3a6   : > { %v3572_v15 = vadd.f32 %v4507_v11, %v3475_v14  ;;  %v4444_v16 = vpop.f32.mrb[56].mxu0  ;;  %v4508_v17 = vpop.f32.mrb[56].mxu1  ;;  %v3601_v20 = vmax.f32 %v3569_v13, 0.0 }
 0x3a7   : > { %v4445_v18 = vpop.f32.mrb[57].mxu0  ;;  %v4509_v19 = vpop.f32.mrb[57].mxu1 }
 0x3a8   : > { %v3602_v21 = vmax.f32 %v3572_v15, 0.0  ;;  %v4446_v22 = vadd.f32 %v4445_v18, %v4444_v16  ;;  %v4510_v40 = vadd.f32 %v4509_v19, %v4508_v17  ;;  %v4447_v23 = vpop.f32.mrb[58].mxu0  ;;  %v4511_v41 = vpop.f32.mrb[58].mxu1 }
 0x3a9   : > { %v4448_v24 = vpop.f32.mrb[59].mxu0  ;;  %v4512_v42 = vpop.f32.mrb[59].mxu1 }
 0x3aa   : > { %v3612_v43 = vpack.c.bf16 %v3602_v21, %v3601_v20  ;;  %v3480_v25 = vadd.f32 %v4446_v22, %v6133_v29  ;;  %v4449_v26 = vadd.f32 %v4448_v24, %v4447_v23  ;;  %v4513_v27 = vadd.f32 %v4512_v42, %v4511_v41 }
 0x3ac   : > { %v3577_v28 = vadd.f32 %v4510_v40, %v3480_v25  ;;  %v3483_v30 = vadd.f32 %v4449_v26, %v6133_v29  ;;  %4561 = vmatmul.mubr.bf16.vlgmr.msra.gmra.mrb[64].mxu1 %v3612_v43 }
 0x3ae   : > { %v3580_v31 = vadd.f32 %v4513_v27, %v3483_v30  ;;  %v4450_v33 = vpop.f32.mrb[60].mxu0  ;;  %v4514_v34 = vpop.f32.mrb[60].mxu1  ;;  %v3603_v37 = vmax.f32 %v3577_v28, 0.0 }
 0x3af   : > { %v4451_v35 = vpop.f32.mrb[61].mxu0  ;;  %v4515_v36 = vpop.f32.mrb[61].mxu1 }
 0x3b0   : > { %v3604_v38 = vmax.f32 %v3580_v31, 0.0  ;;  %v4452_v39 = vadd.f32 %v4451_v35, %v4450_v33  ;;  %v4516_v44 = vadd.f32 %v4515_v36, %v4514_v34  ;;  %v4453_v32 = vpop.f32.mrb[62].mxu0  ;;  %v4517_v45 = vpop.f32.mrb[62].mxu1 }
 0x3b1   : > { %v4454_v46 = vpop.f32.mrb[63].mxu0  ;;  %v4518_v47 = vpop.f32.mrb[63].mxu1 }
 0x3b2   : > { %v3488_v48 = vadd.f32 %v4452_v39, %v6133_v29  ;;  %v4455_v49 = vadd.f32 %v4454_v46, %v4453_v32  ;;  %v4519_v50 = vadd.f32 %v4518_v47, %v4517_v45  ;;  %v3613_v51 = vpack.c.bf16 %v3604_v38, %v3603_v37 }
 0x3b4   : > { %v3585_v52 = vadd.f32 %v4516_v44, %v3488_v48  ;;  %v3491_v53 = vadd.f32 %v4455_v49, %v6133_v29  ;;  %4564 = vmatprep.mubr.bf16.mxu1 %v3613_v51 }
 0x3b6   : > { %v3588_v54 = vadd.f32 %v4519_v50, %v3491_v53  ;;  %v3605_v55 = vmax.f32 %v3585_v52, 0.0 }
 0x3b8   : > { %v3606_v56 = vmax.f32 %v3588_v54, 0.0 }
 0x3ba   : > { %v3614_v57 = vpack.c.bf16 %v3606_v56, %v3605_v55 }
 0x3bc   : > { %4565 = vmatmul.mubr.bf16.gmra.mrb[68].mxu1 %v3614_v57 }
 0x45f   : > { %v4554_v58 = vpop.f32.mrb[64].mxu0 }
 0x460   : > { %v3720_v60 = vpop.f32.mrb[65].mxu0  ;;  %v3729_v62 = vadd.f32 %v4554_v58, %v4300_v59 }
 0x461   : > { %v4555_v61 = vpop.f32.mrb[66].mxu0  ;;  %v3721_v1 = vadd.f32 %v4300_v59, %v3720_v60 }
 0x462   : > { %v3732_v63 = vadd.f32 %v4555_v61, %v4300_v59  ;;  %v3723_v0 = vpop.f32.mrb[67].mxu0 }
 0x463   : > { %v3724_v29 = vadd.f32 %v4300_v59, %v3723_v0 }
 0x464   : > { %v4353_v2 = vpack.c.bf16 %v3732_v63, %v3729_v62 }
 0x465   : > { %v4348_v3 = vpack.c.bf16 %v3724_v29, %v3721_v1 }
 0x466   : > { %4385 = vst [vmem:[%s6156_s23 + $0x8] sm:$0xff] %v4353_v2  }
 0x467   : > { %4349 = vst [vmem:[%s6156_s23] sm:$0xff] %v4348_v3  }
 0x46f   : > { %v4558_v4 = vpop.f32.mrb[68].mxu0 }
 0x470   : > { %v3736_v5 = vpop.f32.mrb[69].mxu0  ;;  %v3745_v7 = vadd.f32 %v4558_v4, %v4300_v59 }
 0x471   : > { %v4559_v6 = vpop.f32.mrb[70].mxu0  ;;  %v3737_v10 = vadd.f32 %v4300_v59, %v3736_v5 }
 0x472   : > { %v3748_v8 = vadd.f32 %v4559_v6, %v4300_v59  ;;  %v3739_v9 = vpop.f32.mrb[71].mxu0 }
 0x473   : > { %v3740_v11 = vadd.f32 %v4300_v59, %v3739_v9 }
 0x474   : > { %v4363_v12 = vpack.c.bf16 %v3748_v8, %v3745_v7 }
 0x475   : > { %v4358_v13 = vpack.c.bf16 %v3740_v11, %v3737_v10 }
 0x476   : > { %4387 = vst [vmem:[%s6156_s23 + $0x18] sm:$0xff] %v4363_v12  }
 0x477   : > { %4386 = vst [vmem:[%s6156_s23 + $0x10] sm:$0xff] %v4358_v13  }
 0x47f   : > { %v4562_v14 = vpop.f32.mrb[64].mxu1 }
 0x480   : > { %v3752_v15 = vpop.f32.mrb[65].mxu1  ;;  %v3761_v17 = vadd.f32 %v4562_v14, %v4300_v59 }
 0x481   : > { %v4563_v16 = vpop.f32.mrb[66].mxu1  ;;  %v3753_v20 = vadd.f32 %v4300_v59, %v3752_v15 }
 0x482   : > { %v3764_v18 = vadd.f32 %v4563_v16, %v4300_v59  ;;  %v3755_v19 = vpop.f32.mrb[67].mxu1 }
 0x483   : > { %v3756_v21 = vadd.f32 %v4300_v59, %v3755_v19 }
 0x484   : > { %v4373_v22 = vpack.c.bf16 %v3764_v18, %v3761_v17 }
 0x485   : > { %v4368_v40 = vpack.c.bf16 %v3756_v21, %v3753_v20 }
 0x486   : > { %4389 = vst [vmem:[%s6156_s23 + $0x28] sm:$0xff] %v4373_v22  }
 0x487   : > { %4388 = vst [vmem:[%s6156_s23 + $0x20] sm:$0xff] %v4368_v40  }
 0x48f   : > { %v4566_v23 = vpop.f32.mrb[68].mxu1 }
 0x490   : > { %v3768_v41 = vpop.f32.mrb[69].mxu1  ;;  %v3777_v42 = vadd.f32 %v4566_v23, %v4300_v59 }
 0x491   : > { %v4567_v24 = vpop.f32.mrb[70].mxu1  ;;  %v3769_v26 = vadd.f32 %v4300_v59, %v3768_v41 }
 0x492   : > { %v3780_v43 = vadd.f32 %v4567_v24, %v4300_v59  ;;  %v3771_v25 = vpop.f32.mrb[71].mxu1 }
 0x493   : > { %v3772_v27 = vadd.f32 %v4300_v59, %v3771_v25 }
 0x494   : > { %v4383_v28 = vpack.c.bf16 %v3780_v43, %v3777_v42 }
 0x495   : > { %v4378_v30 = vpack.c.bf16 %v3772_v27, %v3769_v26 }
 0x496   : > { %4391 = vst [vmem:[%s6156_s23 + $0x38] sm:$0xff] %v4383_v28  }
 0x497   : > { %4390 = vst [vmem:[%s6156_s23 + $0x30] sm:$0xff] %v4378_v30  }
 0x498 PF: > { %p20_p5 = scmp.ge.s32.totalorder %s5844_s20, 6   ;;  %s6201_s24 = smov %s5605_s25 }
 0x499   : > { %s6202_s25 = smov %s5609_s26  ;;  %s6203_s26 = smov %s5856_s10 }
 0x49a   : > { %s6204_s27 = smov %s5844_s20  ;;  %22 = sbr.rel (!%p20_p5) target bundleno = 6 (0x6), region = 112 }
 0x4a1   :  { %3885 = vsyncpa [#allocation3], 1 }
 0x4a2   :  { %3887 = vsyncpa [#allocation3 + $0x1], 1 }
 0x4a3   :  { %3888 = vsyncpa [#allocation5], 1 }
 0x4a4   :  { %3889 = vsyncpa [#allocation8], 1 }
 0x4a5   :  { %3890 = vsyncpa [#allocation11], 1 }

</bundles_post_ra>
